<compile_context>
chip_gen: v6e
topology: v6e:2x2x1
jax: 0.10.0
libtpu: 0.0.40
codegen_flags: <defaults>
</compile_context>

<pallas_src>
import functools

import numpy as np
import jax
import jax.numpy as jnp
from jax.experimental import pallas as pl
from jax.experimental.pallas import tpu as pltpu

KSIZE = 7
PAD = 3


def _cbam_kernel(C, HW, shifts, x_ref, wc_ref, bc_ref, wm_ref, o_ref):
    x = x_ref[...].astype(jnp.float32)                            # (C, HW) lane-dense

    # ---------- Channel attention: sigmoid(Wc @ avgpool(x) + bc) ----------
    pooled = jnp.sum(x, axis=1, keepdims=True) * (1.0 / HW)       # (C, 1)
    logits = jnp.dot(wc_ref[...], pooled,
                     preferred_element_type=jnp.float32) + bc_ref[...]   # MXU matvec
    x_ca = x * jax.nn.sigmoid(logits)                             # (C, HW), one VPU mul

    # ---------- Channel mean / max maps stacked into one (2, HW) tile ----------
    mean_map = jnp.sum(x_ca, axis=0, keepdims=True) * (1.0 / C)   # (1, HW)
    max_map = jnp.max(x_ca, axis=0, keepdims=True)                # (1, HW)
    maps = jnp.concatenate([mean_map, max_map], axis=0)           # (2, HW)

    # ---------- Spatial attention: 7x7 conv via static lane-rolls + masked weights ----------
    # Tap (kh, kw) of the zero-padded conv is a roll of the flat maps by
    # -(dh*W + dw) lanes; positions where the roll would wrap across rows or the
    # image border are exactly the zero-padded ones and are zeroed by the
    # precomputed (weight * validity-mask) planes.  Mean/max rows share each roll.
    acc2 = jnp.zeros((2, HW), jnp.float32)
    for t, s in enumerate(shifts):                                # 49 static taps
        r = maps if s == 0 else pltpu.roll(maps, shift=s, axis=1)
        acc2 = acc2 + wm_ref[t] * r                               # (2, HW) FMA
    s_map = jax.nn.sigmoid(jnp.sum(acc2, axis=0, keepdims=True))  # (1, HW)

    # ---------- Output: (channel-attended x) * spatial attention ----------
    o_ref[...] = (x_ca * s_map).astype(o_ref.dtype)               # lane-dense store


def cbam_pallas(x, wc, bc, ws):
    """x: (B, C, H, W); wc: (C, C); bc: (C,); ws: (1, 2, 7, 7)."""
    B, C, H, W = x.shape
    HW = H * W
    NT = KSIZE * KSIZE

    # Lane-dense view: (B, C, H, W) -> (B, C, H*W) is a free row-major relabel.
    x_flat = x.reshape(B, C, HW)

    wc_f = wc.astype(jnp.float32)                                 # (C, C)
    bc2 = bc.reshape(C, 1).astype(jnp.float32)                    # (C, 1)
    ws_f = np.asarray(ws, np.float32).reshape(2, NT)              # [mean-wts, max-wts]

    # Per conv tap: flat-layout lane shift and boundary-validity mask (built on host).
    hh = np.arange(H)[:, None]
    ww = np.arange(W)[None, :]
    wm = np.zeros((NT, 2, HW), np.float32)                        # (tap, {mean,max}, HW)
    shifts = []
    t = 0
    for kh in range(KSIZE):
        for kw in range(KSIZE):
            dh, dw = kh - PAD, kw - PAD
            valid = ((hh + dh >= 0) & (hh + dh < H) & (ww + dw >= 0) & (ww + dw < W))
            mask = valid.reshape(HW).astype(np.float32)
            wm[t, 0] = ws_f[0, t] * mask
            wm[t, 1] = ws_f[1, t] * mask
            shifts.append(int((-(dh * W + dw)) % HW))             # np.roll convention
            t += 1
    wm = jnp.asarray(wm)                                          # (49, 2, HW)

    kernel = functools.partial(_cbam_kernel, C, HW, tuple(shifts))
    out_flat = pl.pallas_call(
        kernel,
        out_shape=jax.ShapeDtypeStruct((B, C, HW), x.dtype),
        grid=(B,),
        in_specs=[
            pl.BlockSpec((None, C, HW), lambda b: (b, 0, 0)),     # x slab (lane-dense)
            pl.BlockSpec((C, C), lambda b: (0, 0)),               # channel fc weight
            pl.BlockSpec((C, 1), lambda b: (0, 0)),               # channel fc bias
            pl.BlockSpec((NT, 2, HW), lambda b: (0, 0, 0)),       # conv weight*mask planes
        ],
        out_specs=pl.BlockSpec((None, C, HW), lambda b: (b, 0, 0)),
        compiler_params=pltpu.CompilerParams(dimension_semantics=("parallel",)),
    )(x_flat, wc_f, bc2, wm)
    return out_flat.reshape(B, C, H, W)


def cbam_reference(x, wc, bc, ws):
    """Pure-JAX reference of the same CBAM forward (for validation)."""
    pooled = jnp.mean(x, axis=(2, 3))                             # (B, C)
    attn = jax.nn.sigmoid(pooled @ wc.T + bc)[:, :, None, None]
    x_ca = x * attn
    mean_map = jnp.mean(x_ca, axis=1, keepdims=True)
    max_map = jnp.max(x_ca, axis=1, keepdims=True)
    maps = jnp.concatenate([mean_map, max_map], axis=1)           # (B, 2, H, W)
    conv = jax.lax.conv_general_dilated(
        maps, ws, window_strides=(1, 1), padding=((PAD, PAD), (PAD, PAD)),
        dimension_numbers=("NCHW", "OIHW", "NCHW"))
    return x_ca * jax.nn.sigmoid(conv)


if __name__ == "__main__":
    key = jax.random.PRNGKey(0)
    kx, kw1, kb1, kw2 = jax.random.split(key, 4)
    B, C, H, W = 2, 8, 16, 16

    x = jax.random.normal(kx, (B, C, H, W), jnp.float32)
    wc = jax.random.normal(kw1, (C, C), jnp.float32) * 0.2               # Conv1x1 weight (O, I)
    bc = jax.random.normal(kb1, (C,), jnp.float32) * 0.1                 # Conv1x1 bias
    ws = jax.random.normal(kw2, (1, 2, KSIZE, KSIZE), jnp.float32) * 0.2 # 7x7 conv weight

    out = jax.block_until_ready(cbam_pallas(x, wc, bc, ws))
    ref = cbam_reference(x, wc, bc, ws)
    assert out.shape == x.shape and out.dtype == x.dtype
    # Slightly relaxed tolerance: the in-kernel channel matvec runs on the MXU,
    # whose f32 path may use multi-pass bf16 accumulation; structural errors
    # (wrong shift/mask/weight) would be orders of magnitude larger.
    err = float(jnp.max(jnp.abs(out - ref)))
    assert jnp.allclose(out, ref, rtol=1e-3, atol=1e-3), err
    print("KERNEL_OK")
</pallas_src>

<mosaic_0001>
module attributes {stable_mosaic.version = 11 : i64} {
  func.func @_cbam_kernel(%arg0: i32, %arg1: memref<1x8x256xf32, #tpu.memory_space<vmem>>, %arg2: memref<8x8xf32, #tpu.memory_space<vmem>>, %arg3: memref<8x1xf32, #tpu.memory_space<vmem>>, %arg4: memref<49x2x256xf32, #tpu.memory_space<vmem>>, %arg5: memref<1x8x256xf32, #tpu.memory_space<vmem>>) attributes {dimension_semantics = [#tpu.dimension_semantics<parallel>], iteration_bounds = array<i64: 2>, scalar_prefetch = 0 : i64, scratch_operands = 0 : i64, tpu.core_type = #tpu.core_type<tc>, window_params = [{transform_indices = @transform_0, window_bounds = array<i64: 1, 8, 256>}, {pipeline_mode = #tpu.pipeline_mode<synchronous>, transform_indices = @transform_1, window_bounds = array<i64: 8, 8>}, {pipeline_mode = #tpu.pipeline_mode<synchronous>, transform_indices = @transform_2, window_bounds = array<i64: 8, 1>}, {pipeline_mode = #tpu.pipeline_mode<synchronous>, transform_indices = @transform_3, window_bounds = array<i64: 49, 2, 256>}, {transform_indices = @transform_4, window_bounds = array<i64: 1, 8, 256>}]} {
    %c0 = arith.constant 0 : index
    %c0_0 = arith.constant 0 : index
    %c0_1 = arith.constant 0 : index
    %0 = vector.load %arg1[%c0, %c0_0, %c0_1] : memref<1x8x256xf32, #tpu.memory_space<vmem>>, vector<1x8x256xf32>
    %1 = vector.shape_cast %0 : vector<1x8x256xf32> to vector<8x256xf32>
    %cst = arith.constant dense<0.000000e+00> : vector<8xf32>
    %2 = vector.multi_reduction <add>, %1, %cst [1] : vector<8x256xf32> to vector<8xf32>
    %3 = vector.shape_cast %2 : vector<8xf32> to vector<8x1xf32>
    %cst_2 = arith.constant 3.906250e-03 : f32
    %4 = vector.broadcast %cst_2 : f32 to vector<8x1xf32>
    %5 = arith.mulf %3, %4 : vector<8x1xf32>
    %c0_3 = arith.constant 0 : index
    %c0_4 = arith.constant 0 : index
    %6 = vector.load %arg2[%c0_3, %c0_4] : memref<8x8xf32, #tpu.memory_space<vmem>>, vector<8x8xf32>
    %cst_5 = arith.constant dense<0.000000e+00> : vector<8x1xf32>
    %7 = tpu.matmul %6, %5, %cst_5 {dimension_numbers = #tpu.dot_dimension_numbers<[1], [0], [0], [1], [0, 0, 1, 1], [], []>} : vector<8x8xf32>, vector<8x1xf32>, vector<8x1xf32> -> vector<8x1xf32>
    %c0_6 = arith.constant 0 : index
    %c0_7 = arith.constant 0 : index
    %8 = vector.load %arg3[%c0_6, %c0_7] : memref<8x1xf32, #tpu.memory_space<vmem>>, vector<8x1xf32>
    %9 = arith.addf %7, %8 : vector<8x1xf32>
    %10 = arith.negf %9 : vector<8x1xf32>
    %11 = math.exp %10 : vector<8x1xf32>
    %cst_8 = arith.constant 1.000000e+00 : f32
    %12 = vector.broadcast %cst_8 : f32 to vector<8x1xf32>
    %13 = arith.addf %12, %11 : vector<8x1xf32>
    %14 = arith.divf %12, %13 : vector<8x1xf32>
    %15 = vector.broadcast %14 : vector<8x1xf32> to vector<8x256xf32>
    %16 = arith.mulf %1, %15 : vector<8x256xf32>
    %cst_9 = arith.constant dense<0.000000e+00> : vector<256xf32>
    %17 = vector.multi_reduction <add>, %16, %cst_9 [0] : vector<8x256xf32> to vector<256xf32>
    %18 = vector.shape_cast %17 : vector<256xf32> to vector<1x256xf32>
    %cst_10 = arith.constant 1.250000e-01 : f32
    %19 = vector.broadcast %cst_10 : f32 to vector<1x256xf32>
    %20 = arith.mulf %18, %19 : vector<1x256xf32>
    %cst_11 = arith.constant dense<0xFF800000> : vector<256xf32>
    %21 = vector.multi_reduction <maximumf>, %16, %cst_11 [0] : vector<8x256xf32> to vector<256xf32>
    %22 = vector.shape_cast %21 : vector<256xf32> to vector<1x256xf32>
    %23 = tpu.concatenate %20, %22 in 0 : vector<1x256xf32>, vector<1x256xf32> -> vector<2x256xf32>
    %cst_12 = arith.constant 0.000000e+00 : f32
    %24 = vector.broadcast %cst_12 : f32 to vector<2x256xf32>
    %c51_i32 = arith.constant 51 : i32
    %25 = tpu.dynamic_rotate %23 by %c51_i32 dim 1 : vector<2x256xf32>, i32 -> vector<2x256xf32>
    %c0_13 = arith.constant 0 : index
    %c0_14 = arith.constant 0 : index
    %c0_15 = arith.constant 0 : index
    %26 = vector.load %arg4[%c0_13, %c0_14, %c0_15] : memref<49x2x256xf32, #tpu.memory_space<vmem>>, vector<1x2x256xf32>
    %27 = vector.shape_cast %26 : vector<1x2x256xf32> to vector<2x256xf32>
    %28 = arith.mulf %27, %25 : vector<2x256xf32>
    %29 = arith.addf %24, %28 : vector<2x256xf32>
    %c50_i32 = arith.constant 50 : i32
    %30 = tpu.dynamic_rotate %23 by %c50_i32 dim 1 : vector<2x256xf32>, i32 -> vector<2x256xf32>
    %c1 = arith.constant 1 : index
    %c0_16 = arith.constant 0 : index
    %c0_17 = arith.constant 0 : index
    %31 = vector.load %arg4[%c1, %c0_16, %c0_17] : memref<49x2x256xf32, #tpu.memory_space<vmem>>, vector<1x2x256xf32>
    %32 = vector.shape_cast %31 : vector<1x2x256xf32> to vector<2x256xf32>
    %33 = arith.mulf %32, %30 : vector<2x256xf32>
    %34 = arith.addf %29, %33 : vector<2x256xf32>
    %c49_i32 = arith.constant 49 : i32
    %35 = tpu.dynamic_rotate %23 by %c49_i32 dim 1 : vector<2x256xf32>, i32 -> vector<2x256xf32>
    %c2 = arith.constant 2 : index
    %c0_18 = arith.constant 0 : index
    %c0_19 = arith.constant 0 : index
    %36 = vector.load %arg4[%c2, %c0_18, %c0_19] : memref<49x2x256xf32, #tpu.memory_space<vmem>>, vector<1x2x256xf32>
    %37 = vector.shape_cast %36 : vector<1x2x256xf32> to vector<2x256xf32>
    %38 = arith.mulf %37, %35 : vector<2x256xf32>
    %39 = arith.addf %34, %38 : vector<2x256xf32>
    %c48_i32 = arith.constant 48 : i32
    %40 = tpu.dynamic_rotate %23 by %c48_i32 dim 1 : vector<2x256xf32>, i32 -> vector<2x256xf32>
    %c3 = arith.constant 3 : index
    %c0_20 = arith.constant 0 : index
    %c0_21 = arith.constant 0 : index
    %41 = vector.load %arg4[%c3, %c0_20, %c0_21] : memref<49x2x256xf32, #tpu.memory_space<vmem>>, vector<1x2x256xf32>
    %42 = vector.shape_cast %41 : vector<1x2x256xf32> to vector<2x256xf32>
    %43 = arith.mulf %42, %40 : vector<2x256xf32>
    %44 = arith.addf %39, %43 : vector<2x256xf32>
    %c47_i32 = arith.constant 47 : i32
    %45 = tpu.dynamic_rotate %23 by %c47_i32 dim 1 : vector<2x256xf32>, i32 -> vector<2x256xf32>
    %c4 = arith.constant 4 : index
    %c0_22 = arith.constant 0 : index
    %c0_23 = arith.constant 0 : index
    %46 = vector.load %arg4[%c4, %c0_22, %c0_23] : memref<49x2x256xf32, #tpu.memory_space<vmem>>, vector<1x2x256xf32>
    %47 = vector.shape_cast %46 : vector<1x2x256xf32> to vector<2x256xf32>
    %48 = arith.mulf %47, %45 : vector<2x256xf32>
    %49 = arith.addf %44, %48 : vector<2x256xf32>
    %c46_i32 = arith.constant 46 : i32
    %50 = tpu.dynamic_rotate %23 by %c46_i32 dim 1 : vector<2x256xf32>, i32 -> vector<2x256xf32>
    %c5 = arith.constant 5 : index
    %c0_24 = arith.constant 0 : index
    %c0_25 = arith.constant 0 : index
    %51 = vector.load %arg4[%c5, %c0_24, %c0_25] : memref<49x2x256xf32, #tpu.memory_space<vmem>>, vector<1x2x256xf32>
    %52 = vector.shape_cast %51 : vector<1x2x256xf32> to vector<2x256xf32>
    %53 = arith.mulf %52, %50 : vector<2x256xf32>
    %54 = arith.addf %49, %53 : vector<2x256xf32>
    %c45_i32 = arith.constant 45 : i32
    %55 = tpu.dynamic_rotate %23 by %c45_i32 dim 1 : vector<2x256xf32>, i32 -> vector<2x256xf32>
    %c6 = arith.constant 6 : index
    %c0_26 = arith.constant 0 : index
    %c0_27 = arith.constant 0 : index
    %56 = vector.load %arg4[%c6, %c0_26, %c0_27] : memref<49x2x256xf32, #tpu.memory_space<vmem>>, vector<1x2x256xf32>
    %57 = vector.shape_cast %56 : vector<1x2x256xf32> to vector<2x256xf32>
    %58 = arith.mulf %57, %55 : vector<2x256xf32>
    %59 = arith.addf %54, %58 : vector<2x256xf32>
    %c35_i32 = arith.constant 35 : i32
    %60 = tpu.dynamic_rotate %23 by %c35_i32 dim 1 : vector<2x256xf32>, i32 -> vector<2x256xf32>
    %c7 = arith.constant 7 : index
    %c0_28 = arith.constant 0 : index
    %c0_29 = arith.constant 0 : index
    %61 = vector.load %arg4[%c7, %c0_28, %c0_29] : memref<49x2x256xf32, #tpu.memory_space<vmem>>, vector<1x2x256xf32>
    %62 = vector.shape_cast %61 : vector<1x2x256xf32> to vector<2x256xf32>
    %63 = arith.mulf %62, %60 : vector<2x256xf32>
    %64 = arith.addf %59, %63 : vector<2x256xf32>
    %c34_i32 = arith.constant 34 : i32
    %65 = tpu.dynamic_rotate %23 by %c34_i32 dim 1 : vector<2x256xf32>, i32 -> vector<2x256xf32>
    %c8 = arith.constant 8 : index
    %c0_30 = arith.constant 0 : index
    %c0_31 = arith.constant 0 : index
    %66 = vector.load %arg4[%c8, %c0_30, %c0_31] : memref<49x2x256xf32, #tpu.memory_space<vmem>>, vector<1x2x256xf32>
    %67 = vector.shape_cast %66 : vector<1x2x256xf32> to vector<2x256xf32>
    %68 = arith.mulf %67, %65 : vector<2x256xf32>
    %69 = arith.addf %64, %68 : vector<2x256xf32>
    %c33_i32 = arith.constant 33 : i32
    %70 = tpu.dynamic_rotate %23 by %c33_i32 dim 1 : vector<2x256xf32>, i32 -> vector<2x256xf32>
    %c9 = arith.constant 9 : index
    %c0_32 = arith.constant 0 : index
    %c0_33 = arith.constant 0 : index
    %71 = vector.load %arg4[%c9, %c0_32, %c0_33] : memref<49x2x256xf32, #tpu.memory_space<vmem>>, vector<1x2x256xf32>
    %72 = vector.shape_cast %71 : vector<1x2x256xf32> to vector<2x256xf32>
    %73 = arith.mulf %72, %70 : vector<2x256xf32>
    %74 = arith.addf %69, %73 : vector<2x256xf32>
    %c32_i32 = arith.constant 32 : i32
    %75 = tpu.dynamic_rotate %23 by %c32_i32 dim 1 : vector<2x256xf32>, i32 -> vector<2x256xf32>
    %c10 = arith.constant 10 : index
    %c0_34 = arith.constant 0 : index
    %c0_35 = arith.constant 0 : index
    %76 = vector.load %arg4[%c10, %c0_34, %c0_35] : memref<49x2x256xf32, #tpu.memory_space<vmem>>, vector<1x2x256xf32>
    %77 = vector.shape_cast %76 : vector<1x2x256xf32> to vector<2x256xf32>
    %78 = arith.mulf %77, %75 : vector<2x256xf32>
    %79 = arith.addf %74, %78 : vector<2x256xf32>
    %c31_i32 = arith.constant 31 : i32
    %80 = tpu.dynamic_rotate %23 by %c31_i32 dim 1 : vector<2x256xf32>, i32 -> vector<2x256xf32>
    %c11 = arith.constant 11 : index
    %c0_36 = arith.constant 0 : index
    %c0_37 = arith.constant 0 : index
    %81 = vector.load %arg4[%c11, %c0_36, %c0_37] : memref<49x2x256xf32, #tpu.memory_space<vmem>>, vector<1x2x256xf32>
    %82 = vector.shape_cast %81 : vector<1x2x256xf32> to vector<2x256xf32>
    %83 = arith.mulf %82, %80 : vector<2x256xf32>
    %84 = arith.addf %79, %83 : vector<2x256xf32>
    %c30_i32 = arith.constant 30 : i32
    %85 = tpu.dynamic_rotate %23 by %c30_i32 dim 1 : vector<2x256xf32>, i32 -> vector<2x256xf32>
    %c12 = arith.constant 12 : index
    %c0_38 = arith.constant 0 : index
    %c0_39 = arith.constant 0 : index
    %86 = vector.load %arg4[%c12, %c0_38, %c0_39] : memref<49x2x256xf32, #tpu.memory_space<vmem>>, vector<1x2x256xf32>
    %87 = vector.shape_cast %86 : vector<1x2x256xf32> to vector<2x256xf32>
    %88 = arith.mulf %87, %85 : vector<2x256xf32>
    %89 = arith.addf %84, %88 : vector<2x256xf32>
    %c29_i32 = arith.constant 29 : i32
    %90 = tpu.dynamic_rotate %23 by %c29_i32 dim 1 : vector<2x256xf32>, i32 -> vector<2x256xf32>
    %c13 = arith.constant 13 : index
    %c0_40 = arith.constant 0 : index
    %c0_41 = arith.constant 0 : index
    %91 = vector.load %arg4[%c13, %c0_40, %c0_41] : memref<49x2x256xf32, #tpu.memory_space<vmem>>, vector<1x2x256xf32>
    %92 = vector.shape_cast %91 : vector<1x2x256xf32> to vector<2x256xf32>
    %93 = arith.mulf %92, %90 : vector<2x256xf32>
    %94 = arith.addf %89, %93 : vector<2x256xf32>
    %c19_i32 = arith.constant 19 : i32
    %95 = tpu.dynamic_rotate %23 by %c19_i32 dim 1 : vector<2x256xf32>, i32 -> vector<2x256xf32>
    %c14 = arith.constant 14 : index
    %c0_42 = arith.constant 0 : index
    %c0_43 = arith.constant 0 : index
    %96 = vector.load %arg4[%c14, %c0_42, %c0_43] : memref<49x2x256xf32, #tpu.memory_space<vmem>>, vector<1x2x256xf32>
    %97 = vector.shape_cast %96 : vector<1x2x256xf32> to vector<2x256xf32>
    %98 = arith.mulf %97, %95 : vector<2x256xf32>
    %99 = arith.addf %94, %98 : vector<2x256xf32>
    %c18_i32 = arith.constant 18 : i32
    %100 = tpu.dynamic_rotate %23 by %c18_i32 dim 1 : vector<2x256xf32>, i32 -> vector<2x256xf32>
    %c15 = arith.constant 15 : index
    %c0_44 = arith.constant 0 : index
    %c0_45 = arith.constant 0 : index
    %101 = vector.load %arg4[%c15, %c0_44, %c0_45] : memref<49x2x256xf32, #tpu.memory_space<vmem>>, vector<1x2x256xf32>
    %102 = vector.shape_cast %101 : vector<1x2x256xf32> to vector<2x256xf32>
    %103 = arith.mulf %102, %100 : vector<2x256xf32>
    %104 = arith.addf %99, %103 : vector<2x256xf32>
    %c17_i32 = arith.constant 17 : i32
    %105 = tpu.dynamic_rotate %23 by %c17_i32 dim 1 : vector<2x256xf32>, i32 -> vector<2x256xf32>
    %c16 = arith.constant 16 : index
    %c0_46 = arith.constant 0 : index
    %c0_47 = arith.constant 0 : index
    %106 = vector.load %arg4[%c16, %c0_46, %c0_47] : memref<49x2x256xf32, #tpu.memory_space<vmem>>, vector<1x2x256xf32>
    %107 = vector.shape_cast %106 : vector<1x2x256xf32> to vector<2x256xf32>
    %108 = arith.mulf %107, %105 : vector<2x256xf32>
    %109 = arith.addf %104, %108 : vector<2x256xf32>
    %c16_i32 = arith.constant 16 : i32
    %110 = tpu.dynamic_rotate %23 by %c16_i32 dim 1 : vector<2x256xf32>, i32 -> vector<2x256xf32>
    %c17 = arith.constant 17 : index
    %c0_48 = arith.constant 0 : index
    %c0_49 = arith.constant 0 : index
    %111 = vector.load %arg4[%c17, %c0_48, %c0_49] : memref<49x2x256xf32, #tpu.memory_space<vmem>>, vector<1x2x256xf32>
    %112 = vector.shape_cast %111 : vector<1x2x256xf32> to vector<2x256xf32>
    %113 = arith.mulf %112, %110 : vector<2x256xf32>
    %114 = arith.addf %109, %113 : vector<2x256xf32>
    %c15_i32 = arith.constant 15 : i32
    %115 = tpu.dynamic_rotate %23 by %c15_i32 dim 1 : vector<2x256xf32>, i32 -> vector<2x256xf32>
    %c18 = arith.constant 18 : index
    %c0_50 = arith.constant 0 : index
    %c0_51 = arith.constant 0 : index
    %116 = vector.load %arg4[%c18, %c0_50, %c0_51] : memref<49x2x256xf32, #tpu.memory_space<vmem>>, vector<1x2x256xf32>
    %117 = vector.shape_cast %116 : vector<1x2x256xf32> to vector<2x256xf32>
    %118 = arith.mulf %117, %115 : vector<2x256xf32>
    %119 = arith.addf %114, %118 : vector<2x256xf32>
    %c14_i32 = arith.constant 14 : i32
    %120 = tpu.dynamic_rotate %23 by %c14_i32 dim 1 : vector<2x256xf32>, i32 -> vector<2x256xf32>
    %c19 = arith.constant 19 : index
    %c0_52 = arith.constant 0 : index
    %c0_53 = arith.constant 0 : index
    %121 = vector.load %arg4[%c19, %c0_52, %c0_53] : memref<49x2x256xf32, #tpu.memory_space<vmem>>, vector<1x2x256xf32>
    %122 = vector.shape_cast %121 : vector<1x2x256xf32> to vector<2x256xf32>
    %123 = arith.mulf %122, %120 : vector<2x256xf32>
    %124 = arith.addf %119, %123 : vector<2x256xf32>
    %c13_i32 = arith.constant 13 : i32
    %125 = tpu.dynamic_rotate %23 by %c13_i32 dim 1 : vector<2x256xf32>, i32 -> vector<2x256xf32>
    %c20 = arith.constant 20 : index
    %c0_54 = arith.constant 0 : index
    %c0_55 = arith.constant 0 : index
    %126 = vector.load %arg4[%c20, %c0_54, %c0_55] : memref<49x2x256xf32, #tpu.memory_space<vmem>>, vector<1x2x256xf32>
    %127 = vector.shape_cast %126 : vector<1x2x256xf32> to vector<2x256xf32>
    %128 = arith.mulf %127, %125 : vector<2x256xf32>
    %129 = arith.addf %124, %128 : vector<2x256xf32>
    %c3_i32 = arith.constant 3 : i32
    %130 = tpu.dynamic_rotate %23 by %c3_i32 dim 1 : vector<2x256xf32>, i32 -> vector<2x256xf32>
    %c21 = arith.constant 21 : index
    %c0_56 = arith.constant 0 : index
    %c0_57 = arith.constant 0 : index
    %131 = vector.load %arg4[%c21, %c0_56, %c0_57] : memref<49x2x256xf32, #tpu.memory_space<vmem>>, vector<1x2x256xf32>
    %132 = vector.shape_cast %131 : vector<1x2x256xf32> to vector<2x256xf32>
    %133 = arith.mulf %132, %130 : vector<2x256xf32>
    %134 = arith.addf %129, %133 : vector<2x256xf32>
    %c2_i32 = arith.constant 2 : i32
    %135 = tpu.dynamic_rotate %23 by %c2_i32 dim 1 : vector<2x256xf32>, i32 -> vector<2x256xf32>
    %c22 = arith.constant 22 : index
    %c0_58 = arith.constant 0 : index
    %c0_59 = arith.constant 0 : index
    %136 = vector.load %arg4[%c22, %c0_58, %c0_59] : memref<49x2x256xf32, #tpu.memory_space<vmem>>, vector<1x2x256xf32>
    %137 = vector.shape_cast %136 : vector<1x2x256xf32> to vector<2x256xf32>
    %138 = arith.mulf %137, %135 : vector<2x256xf32>
    %139 = arith.addf %134, %138 : vector<2x256xf32>
    %c1_i32 = arith.constant 1 : i32
    %140 = tpu.dynamic_rotate %23 by %c1_i32 dim 1 : vector<2x256xf32>, i32 -> vector<2x256xf32>
    %c23 = arith.constant 23 : index
    %c0_60 = arith.constant 0 : index
    %c0_61 = arith.constant 0 : index
    %141 = vector.load %arg4[%c23, %c0_60, %c0_61] : memref<49x2x256xf32, #tpu.memory_space<vmem>>, vector<1x2x256xf32>
    %142 = vector.shape_cast %141 : vector<1x2x256xf32> to vector<2x256xf32>
    %143 = arith.mulf %142, %140 : vector<2x256xf32>
    %144 = arith.addf %139, %143 : vector<2x256xf32>
    %c24 = arith.constant 24 : index
    %c0_62 = arith.constant 0 : index
    %c0_63 = arith.constant 0 : index
    %145 = vector.load %arg4[%c24, %c0_62, %c0_63] : memref<49x2x256xf32, #tpu.memory_space<vmem>>, vector<1x2x256xf32>
    %146 = vector.shape_cast %145 : vector<1x2x256xf32> to vector<2x256xf32>
    %147 = arith.mulf %146, %23 : vector<2x256xf32>
    %148 = arith.addf %144, %147 : vector<2x256xf32>
    %c255_i32 = arith.constant 255 : i32
    %149 = tpu.dynamic_rotate %23 by %c255_i32 dim 1 : vector<2x256xf32>, i32 -> vector<2x256xf32>
    %c25 = arith.constant 25 : index
    %c0_64 = arith.constant 0 : index
    %c0_65 = arith.constant 0 : index
    %150 = vector.load %arg4[%c25, %c0_64, %c0_65] : memref<49x2x256xf32, #tpu.memory_space<vmem>>, vector<1x2x256xf32>
    %151 = vector.shape_cast %150 : vector<1x2x256xf32> to vector<2x256xf32>
    %152 = arith.mulf %151, %149 : vector<2x256xf32>
    %153 = arith.addf %148, %152 : vector<2x256xf32>
    %c254_i32 = arith.constant 254 : i32
    %154 = tpu.dynamic_rotate %23 by %c254_i32 dim 1 : vector<2x256xf32>, i32 -> vector<2x256xf32>
    %c26 = arith.constant 26 : index
    %c0_66 = arith.constant 0 : index
    %c0_67 = arith.constant 0 : index
    %155 = vector.load %arg4[%c26, %c0_66, %c0_67] : memref<49x2x256xf32, #tpu.memory_space<vmem>>, vector<1x2x256xf32>
    %156 = vector.shape_cast %155 : vector<1x2x256xf32> to vector<2x256xf32>
    %157 = arith.mulf %156, %154 : vector<2x256xf32>
    %158 = arith.addf %153, %157 : vector<2x256xf32>
    %c253_i32 = arith.constant 253 : i32
    %159 = tpu.dynamic_rotate %23 by %c253_i32 dim 1 : vector<2x256xf32>, i32 -> vector<2x256xf32>
    %c27 = arith.constant 27 : index
    %c0_68 = arith.constant 0 : index
    %c0_69 = arith.constant 0 : index
    %160 = vector.load %arg4[%c27, %c0_68, %c0_69] : memref<49x2x256xf32, #tpu.memory_space<vmem>>, vector<1x2x256xf32>
    %161 = vector.shape_cast %160 : vector<1x2x256xf32> to vector<2x256xf32>
    %162 = arith.mulf %161, %159 : vector<2x256xf32>
    %163 = arith.addf %158, %162 : vector<2x256xf32>
    %c243_i32 = arith.constant 243 : i32
    %164 = tpu.dynamic_rotate %23 by %c243_i32 dim 1 : vector<2x256xf32>, i32 -> vector<2x256xf32>
    %c28 = arith.constant 28 : index
    %c0_70 = arith.constant 0 : index
    %c0_71 = arith.constant 0 : index
    %165 = vector.load %arg4[%c28, %c0_70, %c0_71] : memref<49x2x256xf32, #tpu.memory_space<vmem>>, vector<1x2x256xf32>
    %166 = vector.shape_cast %165 : vector<1x2x256xf32> to vector<2x256xf32>
    %167 = arith.mulf %166, %164 : vector<2x256xf32>
    %168 = arith.addf %163, %167 : vector<2x256xf32>
    %c242_i32 = arith.constant 242 : i32
    %169 = tpu.dynamic_rotate %23 by %c242_i32 dim 1 : vector<2x256xf32>, i32 -> vector<2x256xf32>
    %c29 = arith.constant 29 : index
    %c0_72 = arith.constant 0 : index
    %c0_73 = arith.constant 0 : index
    %170 = vector.load %arg4[%c29, %c0_72, %c0_73] : memref<49x2x256xf32, #tpu.memory_space<vmem>>, vector<1x2x256xf32>
    %171 = vector.shape_cast %170 : vector<1x2x256xf32> to vector<2x256xf32>
    %172 = arith.mulf %171, %169 : vector<2x256xf32>
    %173 = arith.addf %168, %172 : vector<2x256xf32>
    %c241_i32 = arith.constant 241 : i32
    %174 = tpu.dynamic_rotate %23 by %c241_i32 dim 1 : vector<2x256xf32>, i32 -> vector<2x256xf32>
    %c30 = arith.constant 30 : index
    %c0_74 = arith.constant 0 : index
    %c0_75 = arith.constant 0 : index
    %175 = vector.load %arg4[%c30, %c0_74, %c0_75] : memref<49x2x256xf32, #tpu.memory_space<vmem>>, vector<1x2x256xf32>
    %176 = vector.shape_cast %175 : vector<1x2x256xf32> to vector<2x256xf32>
    %177 = arith.mulf %176, %174 : vector<2x256xf32>
    %178 = arith.addf %173, %177 : vector<2x256xf32>
    %c240_i32 = arith.constant 240 : i32
    %179 = tpu.dynamic_rotate %23 by %c240_i32 dim 1 : vector<2x256xf32>, i32 -> vector<2x256xf32>
    %c31 = arith.constant 31 : index
    %c0_76 = arith.constant 0 : index
    %c0_77 = arith.constant 0 : index
    %180 = vector.load %arg4[%c31, %c0_76, %c0_77] : memref<49x2x256xf32, #tpu.memory_space<vmem>>, vector<1x2x256xf32>
    %181 = vector.shape_cast %180 : vector<1x2x256xf32> to vector<2x256xf32>
    %182 = arith.mulf %181, %179 : vector<2x256xf32>
    %183 = arith.addf %178, %182 : vector<2x256xf32>
    %c239_i32 = arith.constant 239 : i32
    %184 = tpu.dynamic_rotate %23 by %c239_i32 dim 1 : vector<2x256xf32>, i32 -> vector<2x256xf32>
    %c32 = arith.constant 32 : index
    %c0_78 = arith.constant 0 : index
    %c0_79 = arith.constant 0 : index
    %185 = vector.load %arg4[%c32, %c0_78, %c0_79] : memref<49x2x256xf32, #tpu.memory_space<vmem>>, vector<1x2x256xf32>
    %186 = vector.shape_cast %185 : vector<1x2x256xf32> to vector<2x256xf32>
    %187 = arith.mulf %186, %184 : vector<2x256xf32>
    %188 = arith.addf %183, %187 : vector<2x256xf32>
    %c238_i32 = arith.constant 238 : i32
    %189 = tpu.dynamic_rotate %23 by %c238_i32 dim 1 : vector<2x256xf32>, i32 -> vector<2x256xf32>
    %c33 = arith.constant 33 : index
    %c0_80 = arith.constant 0 : index
    %c0_81 = arith.constant 0 : index
    %190 = vector.load %arg4[%c33, %c0_80, %c0_81] : memref<49x2x256xf32, #tpu.memory_space<vmem>>, vector<1x2x256xf32>
    %191 = vector.shape_cast %190 : vector<1x2x256xf32> to vector<2x256xf32>
    %192 = arith.mulf %191, %189 : vector<2x256xf32>
    %193 = arith.addf %188, %192 : vector<2x256xf32>
    %c237_i32 = arith.constant 237 : i32
    %194 = tpu.dynamic_rotate %23 by %c237_i32 dim 1 : vector<2x256xf32>, i32 -> vector<2x256xf32>
    %c34 = arith.constant 34 : index
    %c0_82 = arith.constant 0 : index
    %c0_83 = arith.constant 0 : index
    %195 = vector.load %arg4[%c34, %c0_82, %c0_83] : memref<49x2x256xf32, #tpu.memory_space<vmem>>, vector<1x2x256xf32>
    %196 = vector.shape_cast %195 : vector<1x2x256xf32> to vector<2x256xf32>
    %197 = arith.mulf %196, %194 : vector<2x256xf32>
    %198 = arith.addf %193, %197 : vector<2x256xf32>
    %c227_i32 = arith.constant 227 : i32
    %199 = tpu.dynamic_rotate %23 by %c227_i32 dim 1 : vector<2x256xf32>, i32 -> vector<2x256xf32>
    %c35 = arith.constant 35 : index
    %c0_84 = arith.constant 0 : index
    %c0_85 = arith.constant 0 : index
    %200 = vector.load %arg4[%c35, %c0_84, %c0_85] : memref<49x2x256xf32, #tpu.memory_space<vmem>>, vector<1x2x256xf32>
    %201 = vector.shape_cast %200 : vector<1x2x256xf32> to vector<2x256xf32>
    %202 = arith.mulf %201, %199 : vector<2x256xf32>
    %203 = arith.addf %198, %202 : vector<2x256xf32>
    %c226_i32 = arith.constant 226 : i32
    %204 = tpu.dynamic_rotate %23 by %c226_i32 dim 1 : vector<2x256xf32>, i32 -> vector<2x256xf32>
    %c36 = arith.constant 36 : index
    %c0_86 = arith.constant 0 : index
    %c0_87 = arith.constant 0 : index
    %205 = vector.load %arg4[%c36, %c0_86, %c0_87] : memref<49x2x256xf32, #tpu.memory_space<vmem>>, vector<1x2x256xf32>
    %206 = vector.shape_cast %205 : vector<1x2x256xf32> to vector<2x256xf32>
    %207 = arith.mulf %206, %204 : vector<2x256xf32>
    %208 = arith.addf %203, %207 : vector<2x256xf32>
    %c225_i32 = arith.constant 225 : i32
    %209 = tpu.dynamic_rotate %23 by %c225_i32 dim 1 : vector<2x256xf32>, i32 -> vector<2x256xf32>
    %c37 = arith.constant 37 : index
    %c0_88 = arith.constant 0 : index
    %c0_89 = arith.constant 0 : index
    %210 = vector.load %arg4[%c37, %c0_88, %c0_89] : memref<49x2x256xf32, #tpu.memory_space<vmem>>, vector<1x2x256xf32>
    %211 = vector.shape_cast %210 : vector<1x2x256xf32> to vector<2x256xf32>
    %212 = arith.mulf %211, %209 : vector<2x256xf32>
    %213 = arith.addf %208, %212 : vector<2x256xf32>
    %c224_i32 = arith.constant 224 : i32
    %214 = tpu.dynamic_rotate %23 by %c224_i32 dim 1 : vector<2x256xf32>, i32 -> vector<2x256xf32>
    %c38 = arith.constant 38 : index
    %c0_90 = arith.constant 0 : index
    %c0_91 = arith.constant 0 : index
    %215 = vector.load %arg4[%c38, %c0_90, %c0_91] : memref<49x2x256xf32, #tpu.memory_space<vmem>>, vector<1x2x256xf32>
    %216 = vector.shape_cast %215 : vector<1x2x256xf32> to vector<2x256xf32>
    %217 = arith.mulf %216, %214 : vector<2x256xf32>
    %218 = arith.addf %213, %217 : vector<2x256xf32>
    %c223_i32 = arith.constant 223 : i32
    %219 = tpu.dynamic_rotate %23 by %c223_i32 dim 1 : vector<2x256xf32>, i32 -> vector<2x256xf32>
    %c39 = arith.constant 39 : index
    %c0_92 = arith.constant 0 : index
    %c0_93 = arith.constant 0 : index
    %220 = vector.load %arg4[%c39, %c0_92, %c0_93] : memref<49x2x256xf32, #tpu.memory_space<vmem>>, vector<1x2x256xf32>
    %221 = vector.shape_cast %220 : vector<1x2x256xf32> to vector<2x256xf32>
    %222 = arith.mulf %221, %219 : vector<2x256xf32>
    %223 = arith.addf %218, %222 : vector<2x256xf32>
    %c222_i32 = arith.constant 222 : i32
    %224 = tpu.dynamic_rotate %23 by %c222_i32 dim 1 : vector<2x256xf32>, i32 -> vector<2x256xf32>
    %c40 = arith.constant 40 : index
    %c0_94 = arith.constant 0 : index
    %c0_95 = arith.constant 0 : index
    %225 = vector.load %arg4[%c40, %c0_94, %c0_95] : memref<49x2x256xf32, #tpu.memory_space<vmem>>, vector<1x2x256xf32>
    %226 = vector.shape_cast %225 : vector<1x2x256xf32> to vector<2x256xf32>
    %227 = arith.mulf %226, %224 : vector<2x256xf32>
    %228 = arith.addf %223, %227 : vector<2x256xf32>
    %c221_i32 = arith.constant 221 : i32
    %229 = tpu.dynamic_rotate %23 by %c221_i32 dim 1 : vector<2x256xf32>, i32 -> vector<2x256xf32>
    %c41 = arith.constant 41 : index
    %c0_96 = arith.constant 0 : index
    %c0_97 = arith.constant 0 : index
    %230 = vector.load %arg4[%c41, %c0_96, %c0_97] : memref<49x2x256xf32, #tpu.memory_space<vmem>>, vector<1x2x256xf32>
    %231 = vector.shape_cast %230 : vector<1x2x256xf32> to vector<2x256xf32>
    %232 = arith.mulf %231, %229 : vector<2x256xf32>
    %233 = arith.addf %228, %232 : vector<2x256xf32>
    %c211_i32 = arith.constant 211 : i32
    %234 = tpu.dynamic_rotate %23 by %c211_i32 dim 1 : vector<2x256xf32>, i32 -> vector<2x256xf32>
    %c42 = arith.constant 42 : index
    %c0_98 = arith.constant 0 : index
    %c0_99 = arith.constant 0 : index
    %235 = vector.load %arg4[%c42, %c0_98, %c0_99] : memref<49x2x256xf32, #tpu.memory_space<vmem>>, vector<1x2x256xf32>
    %236 = vector.shape_cast %235 : vector<1x2x256xf32> to vector<2x256xf32>
    %237 = arith.mulf %236, %234 : vector<2x256xf32>
    %238 = arith.addf %233, %237 : vector<2x256xf32>
    %c210_i32 = arith.constant 210 : i32
    %239 = tpu.dynamic_rotate %23 by %c210_i32 dim 1 : vector<2x256xf32>, i32 -> vector<2x256xf32>
    %c43 = arith.constant 43 : index
    %c0_100 = arith.constant 0 : index
    %c0_101 = arith.constant 0 : index
    %240 = vector.load %arg4[%c43, %c0_100, %c0_101] : memref<49x2x256xf32, #tpu.memory_space<vmem>>, vector<1x2x256xf32>
    %241 = vector.shape_cast %240 : vector<1x2x256xf32> to vector<2x256xf32>
    %242 = arith.mulf %241, %239 : vector<2x256xf32>
    %243 = arith.addf %238, %242 : vector<2x256xf32>
    %c209_i32 = arith.constant 209 : i32
    %244 = tpu.dynamic_rotate %23 by %c209_i32 dim 1 : vector<2x256xf32>, i32 -> vector<2x256xf32>
    %c44 = arith.constant 44 : index
    %c0_102 = arith.constant 0 : index
    %c0_103 = arith.constant 0 : index
    %245 = vector.load %arg4[%c44, %c0_102, %c0_103] : memref<49x2x256xf32, #tpu.memory_space<vmem>>, vector<1x2x256xf32>
    %246 = vector.shape_cast %245 : vector<1x2x256xf32> to vector<2x256xf32>
    %247 = arith.mulf %246, %244 : vector<2x256xf32>
    %248 = arith.addf %243, %247 : vector<2x256xf32>
    %c208_i32 = arith.constant 208 : i32
    %249 = tpu.dynamic_rotate %23 by %c208_i32 dim 1 : vector<2x256xf32>, i32 -> vector<2x256xf32>
    %c45 = arith.constant 45 : index
    %c0_104 = arith.constant 0 : index
    %c0_105 = arith.constant 0 : index
    %250 = vector.load %arg4[%c45, %c0_104, %c0_105] : memref<49x2x256xf32, #tpu.memory_space<vmem>>, vector<1x2x256xf32>
    %251 = vector.shape_cast %250 : vector<1x2x256xf32> to vector<2x256xf32>
    %252 = arith.mulf %251, %249 : vector<2x256xf32>
    %253 = arith.addf %248, %252 : vector<2x256xf32>
    %c207_i32 = arith.constant 207 : i32
    %254 = tpu.dynamic_rotate %23 by %c207_i32 dim 1 : vector<2x256xf32>, i32 -> vector<2x256xf32>
    %c46 = arith.constant 46 : index
    %c0_106 = arith.constant 0 : index
    %c0_107 = arith.constant 0 : index
    %255 = vector.load %arg4[%c46, %c0_106, %c0_107] : memref<49x2x256xf32, #tpu.memory_space<vmem>>, vector<1x2x256xf32>
    %256 = vector.shape_cast %255 : vector<1x2x256xf32> to vector<2x256xf32>
    %257 = arith.mulf %256, %254 : vector<2x256xf32>
    %258 = arith.addf %253, %257 : vector<2x256xf32>
    %c206_i32 = arith.constant 206 : i32
    %259 = tpu.dynamic_rotate %23 by %c206_i32 dim 1 : vector<2x256xf32>, i32 -> vector<2x256xf32>
    %c47 = arith.constant 47 : index
    %c0_108 = arith.constant 0 : index
    %c0_109 = arith.constant 0 : index
    %260 = vector.load %arg4[%c47, %c0_108, %c0_109] : memref<49x2x256xf32, #tpu.memory_space<vmem>>, vector<1x2x256xf32>
    %261 = vector.shape_cast %260 : vector<1x2x256xf32> to vector<2x256xf32>
    %262 = arith.mulf %261, %259 : vector<2x256xf32>
    %263 = arith.addf %258, %262 : vector<2x256xf32>
    %c205_i32 = arith.constant 205 : i32
    %264 = tpu.dynamic_rotate %23 by %c205_i32 dim 1 : vector<2x256xf32>, i32 -> vector<2x256xf32>
    %c48 = arith.constant 48 : index
    %c0_110 = arith.constant 0 : index
    %c0_111 = arith.constant 0 : index
    %265 = vector.load %arg4[%c48, %c0_110, %c0_111] : memref<49x2x256xf32, #tpu.memory_space<vmem>>, vector<1x2x256xf32>
    %266 = vector.shape_cast %265 : vector<1x2x256xf32> to vector<2x256xf32>
    %267 = arith.mulf %266, %264 : vector<2x256xf32>
    %268 = arith.addf %263, %267 : vector<2x256xf32>
    %cst_112 = arith.constant dense<0.000000e+00> : vector<256xf32>
    %269 = vector.multi_reduction <add>, %268, %cst_112 [0] : vector<2x256xf32> to vector<256xf32>
    %270 = vector.shape_cast %269 : vector<256xf32> to vector<1x256xf32>
    %271 = arith.negf %270 : vector<1x256xf32>
    %272 = math.exp %271 : vector<1x256xf32>
    %cst_113 = arith.constant 1.000000e+00 : f32
    %273 = vector.broadcast %cst_113 : f32 to vector<1x256xf32>
    %274 = arith.addf %273, %272 : vector<1x256xf32>
    %275 = arith.divf %273, %274 : vector<1x256xf32>
    %276 = vector.broadcast %275 : vector<1x256xf32> to vector<8x256xf32>
    %277 = arith.mulf %16, %276 : vector<8x256xf32>
    %c0_114 = arith.constant 0 : index
    %c0_115 = arith.constant 0 : index
    %c0_116 = arith.constant 0 : index
    %278 = vector.load %arg5[%c0_114, %c0_115, %c0_116] : memref<1x8x256xf32, #tpu.memory_space<vmem>>, vector<1x8x256xf32>
    %279 = vector.shape_cast %278 : vector<1x8x256xf32> to vector<8x256xf32>
    %280 = vector.shape_cast %277 : vector<8x256xf32> to vector<1x8x256xf32>
    tpu.vector_store %arg5[%c0_114, %c0_115, %c0_116], %280 {strides = array<i32>} : memref<1x8x256xf32, #tpu.memory_space<vmem>>, vector<1x8x256xf32>,
    return
  }
  func.func @transform_0(%arg0: i32) -> (i32, i32, i32) {
    %c0_i32 = arith.constant 0 : i32
    %c0_i32_0 = arith.constant 0 : i32
    %c0_i32_1 = arith.constant 0 : i32
    return %arg0, %c0_i32, %c0_i32_0 : i32, i32, i32
  }
  func.func @transform_1(%arg0: i32) -> (i32, i32) {
    %c0_i32 = arith.constant 0 : i32
    %c0_i32_0 = arith.constant 0 : i32
    %c0_i32_1 = arith.constant 0 : i32
    return %c0_i32, %c0_i32_0 : i32, i32
  }
  func.func @transform_2(%arg0: i32) -> (i32, i32) {
    %c0_i32 = arith.constant 0 : i32
    %c0_i32_0 = arith.constant 0 : i32
    %c0_i32_1 = arith.constant 0 : i32
    return %c0_i32, %c0_i32_0 : i32, i32
  }
  func.func @transform_3(%arg0: i32) -> (i32, i32, i32) {
    %c0_i32 = arith.constant 0 : i32
    %c0_i32_0 = arith.constant 0 : i32
    %c0_i32_1 = arith.constant 0 : i32
    %c0_i32_2 = arith.constant 0 : i32
    return %c0_i32, %c0_i32_0, %c0_i32_1 : i32, i32, i32
  }
  func.func @transform_4(%arg0: i32) -> (i32, i32, i32) {
    %c0_i32 = arith.constant 0 : i32
    %c0_i32_0 = arith.constant 0 : i32
    %c0_i32_1 = arith.constant 0 : i32
    return %arg0, %c0_i32, %c0_i32_0 : i32, i32, i32
  }
}

</mosaic_0001>

<bundles_post_ra>
// kernel: tpu_custom_call.1
= control target key start
LH: loop header
LB: loop body
LE: loop exit
PB: predicated region body
PF: predicated region fallthrough
CT: control target
= control target key end

     0   :  { %9 = vsyncpa [#allocation3], 0  ;;  %s2632_s0 = inlined_call_operand.hbm [shape: f32[2,8,256], index: 0, kind: input, shape index: {}]   ;;  %s2633_s1 = inlined_call_operand.vmem [shape: f32[8,8], index: 1, kind: input, shape index: {}]   ;;  %s2634_s2 = inlined_call_operand.vmem [shape: f32[8,1], index: 2, kind: input, shape index: {}]   ;;  %s2635_s3 = inlined_call_operand.hbm [shape: f32[49,2,256], index: 3, kind: input, shape index: {}]   ;;  %s2636_s4 = inlined_call_operand.hbm [shape: f32[2,8,256], index: 4, kind: output, shape index: {}]  }
   0x1   :  { %11 = vsyncpa [#allocation3 + $0x1], 0 }
   0x2   :  { %12 = vsyncpa [#allocation6], 0 }
   0x3   :  { %13 = vsyncpa [#allocation4], 0 }
   0x4   :  { %15 = vsyncpa [#allocation4 + $0x1], 0  ;;  %s1921_s15 = smov 0   ;;  %s1923_s16 = smov 0  }
   0x5   :  { %s1925_s17 = smov 0   ;;  %s1927_s18 = smov 0  }
   0x6 LB: > { %s1942_s19 = sadd.s32 4294967295, %s1837_s18   ;;  %s1562_s20 = sadd.s32 4294967294, %s1837_s18   ;;  %s1837_s18 = sphi %s1927_s18, %s2660_s18   ;;  %s1833_s17 = sphi %s1925_s17, %s2659_s17   ;;  %s1829_s16 = sphi %s1923_s16, %s2658_s16   ;;  %s1825_s15 = sphi %s1921_s15, %s2657_s15  }
   0x7   : > { %p41_p0 = scmp.ne.s32.totalorder %s1829_s16, %s1825_s15  ;;  %p2637_p1 = scmp.eq.s32.totalorder %s1942_s19, 0 }
   0x8   : > { %p134_p3 = scmp.eq.s32.totalorder %s1562_s20, 1  ;;  %p1563_p5 = scmp.ge.s32.totalorder %s1837_s18, 1 }
   0x9   : > { %p1951_p4 = por %p2637_p1, %p41_p0  ;;  %p141_p7 = scmp.lt.s32.totalorder %s1837_s18, 3 }
   0xa   : > { %p1956_p6 = por %p134_p3, %p41_p0  ;;  %s1839_s24 = smov [#allocation5]  }
   0xb   : > { %s2642_s21 = scalar_select %p1951_p4, 1, 0 }
   0xc   : > { %s2643_s22 = scalar_select %p1956_p6, 1, 0 }
   0xd   : > { %p1961_p8 = pnand %p1563_p5, %p141_p7  ;;  %s159_s25 = sshll.u32 %s1839_s24, 4  ;;  %s160_s25 = int_to_ptr.vmem [resolvable:$true] %s159_s25 }
   0xe   : > { %s1975_s27 = sadd.s32 1, %s1837_s18   ;;  %s28_s28 = sadd.s32 1, %s1833_s17 }
   0xf   : > { %s2644_s23 = scalar_select %p1961_p8, 1, 0 }
  0x10   : > { %p1599_p9 = pneg %p1961_p8  ;;  %s25_s29 = ssub.s32 %s1837_s18, %s1975_s27 }
  0x11   : > { %s1726_s30 = scalar_lea.vmem %s160_s25, 3136  ;;  %p1734_p5 = scmp.lt.s32.totalorder %s160_s25, %s160_s25 }
  0x12   : > { %p1970_p11 = pnand %p1599_p9, %p2637_p1  ;;  %p1727_p13 = scmp.ne.s32.totalorder %s160_s25, %s1726_s30 }
  0x13   : > { %p1735_p7 = scmp.lt.s32.totalorder %s1726_s30, %s1726_s30 }
  0x14   : > { %p1717_p12 = pneg %p1970_p11 }
  0x15   : > { %p1736_p10 = por %p1735_p7, %p1734_p5 }
  0x16   : > { %p1729_p0 = pnand %p1727_p13, %p1717_p12 }
  0x18   : > { %p1730_p3 = pneg %p1729_p0 }
  0x1a   : > { %p1737_p2 = pnand %p1736_p10, %p1730_p3 }
  0x1c   : > { %1740 = shalt.err (!%p1737_p2)
}
  0x1d   : > { %s1840_s5 = smov 64   ;;  %s1841_s6 = smov 4  }
  0x1e   : > { %1602 = dma.hbm_to_vmem [thread:$0]  (!%p1970_p11), %s2635_s3, 3136, %s160_s25, [#allocation6], %s1840_s5, %s1840_s5, %s1841_s6  }
  0x1f   : > { %p26_p9 = scmp.eq.s32.totalorder %s25_s29, 0  ;;  %p35_p12 = scmp.ne.s32.totalorder %s1833_s17, %s1829_s16 }
  0x20   : > { %p36_p10 = scmp.eq.s32.totalorder %s1837_s18, 0  ;;  %p1612_p2 = scmp.lt.s32.totalorder %s1837_s18, 2 }
  0x21   : > { %s1992_s9 = scalar_select %p26_p9, %s1833_s17, %s28_s28  }
  0x22   : > { %p37_p13 = por %p36_p10, %p35_p12  ;;  %p2646_p0 = scmp.eq.s32.totalorder %s1942_s19, 1 }
  0x23   : > { %s173_s11 = sand.u32 1, %s1833_s17   ;;  %s1582_s12 = sshll.u32 %s1837_s18, 8 }
  0x24   : > { %p1996_p3 = por %p2646_p0, %p35_p12  ;;  %s1566_s13 = sshll.u32 %s173_s11, 4 }
  0x25   : > { %s2005_s24 = scalar_lea.hbm %s2632_s0, %s1582_s12  ;;  %s177_s25 = scalar_lea.vmem [#allocation2], %s1566_s13 }
  0x26   : > { %s2647_s10 = scalar_select %p1996_p3, 1, 0 }
  0x27   : > { %s185_s26 = sshll.u32 %s177_s25, 4  ;;  %p2007_p11 = pnand %p1612_p2, %p37_p13  ;;  %s186_s26 = int_to_ptr.vmem [resolvable:$true] %s185_s26 }
  0x28   : > { %s174_s29 = scalar_lea.sflag [#allocation3], %s173_s11  ;;  %s1741_s30 = scalar_lea.hbm %s2005_s24, 256 }
  0x29   : > { %p1742_p5 = scmp.ne.s32.totalorder %s2005_s24, %s1741_s30  ;;  %p1743_p7 = pneg %p2007_p11 }
  0x2a   : > { %s1746_s7 = scalar_lea.hbm %s2632_s0, 512  ;;  %p1747_p10 = scmp.lt.s32.totalorder %s2005_s24, %s2632_s0 }
  0x2b   : > { %p1744_p9 = pnand %p1743_p7, %p1742_p5  ;;  %p1748_p2 = scmp.lt.s32.totalorder %s1746_s7, %s1741_s30 }
  0x2d   : > { %p1745_p12 = pneg %p1744_p9  ;;  %p1749_p13 = por %p1748_p2, %p1747_p10 }
  0x2f   : > { %p1750_p0 = pnand %p1749_p13, %p1745_p12 }
  0x31   : > { %1753 = shalt.err (!%p1750_p0)
}
  0x32   : > { %s1754_s13 = scalar_lea.vmem %s186_s26, 256  ;;  %s1842_s11 = smov [#allocation2]  }
  0x33   : > { %p1755_p1 = scmp.ne.s32.totalorder %s186_s26, %s1754_s13  ;;  %s1759_s14 = sshll.u32 %s1842_s11, 4  ;;  %s1760_s14 = int_to_ptr.vmem [resolvable:$false] %s1759_s14 }
  0x34   : > { %s1761_s20 = scalar_lea.vmem %s1760_s14, 512  ;;  %p1762_p5 = scmp.lt.s32.totalorder %s186_s26, %s1760_s14 }
  0x35   : > { %p1757_p6 = pnand %p1755_p1, %p1743_p7  ;;  %p1763_p9 = scmp.lt.s32.totalorder %s1761_s20, %s1754_s13 }
  0x37   : > { %p1758_p3 = pneg %p1757_p6  ;;  %p1764_p4 = por %p1763_p9, %p1762_p5 }
  0x39   : > { %p1765_p8 = pnand %p1764_p4, %p1758_p3 }
  0x3b   : > { %1768 = shalt.err (!%p1765_p8)
}
  0x3c   : > { %1606 = dma.hbm_to_vmem [thread:$0]  (!%p2007_p11), %s2005_s24, 256, %s186_s26, %s174_s29  }
  0x3d   : > { %p2649_p12 = scmp.ne.s32.totalorder %s2644_s23, 0 }
  0x3e   : > { %s2028_s25 = sand.u32 (!%p2649_p12), 1, %s1829_s16   ;;  %p2650_p1 = scmp.ne.s32.totalorder (!%p2649_p12), %s2642_s21, 0 }
  0x3f   : > { %194 = sbr.rel (%p2649_p12) target bundleno = 984 (0x3d8), region = 36  ;;  %s2641_s30 = sshll.u32 (!%p2649_p12), %s2028_s25, 4 }
  0x40   : > { %s197_s5 = scalar_lea.sflag (!%p2649_p12), [#allocation3], %s2028_s25  ;;  %s200_s6 = scalar_lea.vmem (!%p2649_p12), [#allocation2], %s2641_s30 }
  0x44   : > { %1812 = dma.done.wait (%p2650_p1), %s197_s5, 256  }
  0x45   : > { %1814 = vsyncadd (%p2650_p1), %s197_s5, 4294967040  ;;  %p2651_p4 = scmp.eq.s32.totalorder %s1942_s19, 0 }
  0x47   : > { %1816 = dma.done.wait (%p2651_p4), [#allocation6], 3136   ;;  %p2652_p6 = pmov %p2651_p4 }
  0x48   : > { %v229_v0 = vld [vmem:[%s200_s6] sm:$0xff]  ;;  %v230_v1 = vld [vmem:[%s200_s6 + $0x8] sm:$0xff]  ;;  %v1843_v3 = vmov 0.0   ;;  %vm1844_vm0 = vmmov 0   ;;  %vm237_vm1 = vcmask 64512   ;;  %v1845_v7 = vmov 0  }
  0x49   : > { %1818 = vsyncadd (%p2652_p6), [#allocation6], 4294964160  ;;  %v231_v2 = vadd.f32 %v230_v1, %v229_v0  ;;  %1586 = vmatprep.subr.mxu0 %v1843_v3  ;;  %1588 = vmatprep.mubr.msk.f32.mxu0 %vm1844_vm0, %v1843_v3  ;;  %v235_v6 = vld [vmem:[%s2633_s1] sm:$0xff]  ;;  %vm350_vm2 = vcmask 1040384   ;;  %s1846_s28 = smov 45   ;;  %s1847_s29 = smov 51   ;;  %v357_v51 = vlaneseq }
  0x4a   : > { %1702 = vset.pattern.permute.xlu0 %v1845_v7  ;;  %v236_v8 = vld [vmem:[%s2634_s2] sm:$0xff]  ;;  %s1848_s7 = smov 35   ;;  %s1849_s8 = smov 34   ;;  %v1884_v55 = vmov 1983009808  }
  0x4b   : > { %232 = vadd.xlane.f32.xlu0 %v231_v2  ;;  %s1850_s12 = smov 50   ;;  %s1851_s13 = smov 33   ;;  %v2184_v52 = vand.u32 127, %v357_v51  ;;  %v367_v56 = vunpack.c.l.s4 %v1884_v55  ;;  %v370_v62 = vshrl.u32 %v357_v51, 7 }
  0x4c   : > { %s1852_s11 = smov 32   ;;  %s1853_s14 = smov 49  }
  0x4d   : > { %s1854_s20 = smov 31   ;;  %s1855_s5 = smov 30   ;;  %vm380_vm3 = vcmp.lt.s32.totalorder %v2184_v52, 50  ;;  %vm359_vm4 = vcmp.lt.s32.totalorder %v2184_v52, 51  ;;  %v368_v61 = vunpack.c.0.s8 %v367_v56  ;;  %vm402_vm5 = vcmp.lt.s32.totalorder %v2184_v52, 49 }
  0x4e   : > { %s1856_s6 = smov 48   ;;  %s1857_s23 = smov 29   ;;  %vm424_vm6 = vcmp.lt.s32.totalorder %v2184_v52, 48  ;;  %vm446_vm7 = vcmp.lt.s32.totalorder %v2184_v52, 47  ;;  %vm468_vm8 = vcmp.lt.s32.totalorder %v2184_v52, 46  ;;  %vm490_vm9 = vcmp.lt.s32.totalorder %v2184_v52, 45 }
  0x4f   : > { %s1858_s24 = smov 19   ;;  %s1859_s21 = smov 47   ;;  %vm512_vm10 = vcmp.lt.s32.totalorder %v2184_v52, 35  ;;  %vm534_vm11 = vcmp.lt.s32.totalorder %v2184_v52, 34  ;;  %vm556_vm12 = vcmp.lt.s32.totalorder %v2184_v52, 33  ;;  %vm578_vm13 = vcmp.lt.s32.totalorder %v2184_v52, 32 }
  0x50   : > { %s1860_s26 = smov 18   ;;  %s1866_s30 = smov 13   ;;  %vm600_vm14 = vcmp.lt.s32.totalorder %v2184_v52, 31  ;;  %vm622_vm15 = vcmp.lt.s32.totalorder %v2184_v52, 30  ;;  %vm644_vm0 = vcmp.lt.s32.totalorder %v2184_v52, 29 }
  0x51   : > { %p2654_p3 = scmp.ne.s32.totalorder %s2647_s10, 0 }
  0xd4   : > { %v233_v4 = vpop.xlane.xlu0 %232 }
  0xd5   : > { %v234_v5 = vmul.f32 0.00390625, %v233_v4 }
  0xd7   : > { %1587 = vmatpush3.msra.mxu0 %v234_v5 }
  0xd8   : > { %1589 = vmatmul.mubr.msk.f32.vlgmr.msra.gmra.mxu0 %vm237_vm1, %v235_v6  ;;  %v2203_v6 = vsub.s32 %v368_v61, %v370_v62  ;;  %vm666_vm1 = vcmp.lt.s32.totalorder %v2184_v52, 19 }
 0x198   : > { %v307_v9 = vpop.f32.mrf.mxu0 }
 0x199   : > { %v308_v10 = vadd.f32 %v307_v9, %v236_v8 }
 0x19a   : > { %v1590_v11 = vpop.f32.mrf.mxu0 }
 0x19b   : > { %v1574_v12 = vmul.f32 -1.442695, %v308_v10 }
 0x19d   : > { %1703 = vpow2.f32 %v1574_v12  ;;  %v384_v12 = vld [vmem:[#allocation5 + $0x4] sm:$0xf] }
 0x1aa   : > { %v1704_v13 = vpop.eup %1703 }
 0x1ab   : > { %v314_v14 = vadd.f32 1.0, %v1704_v13 }
 0x1ad   : > { %1705 = vrcp.f32 %v314_v14 }
 0x1ba   : > { %v1706_v15 = vpop.eup %1705 }
 0x1bb   : > { %319 = vperm.xlu0 %1702, %v1706_v15   ;;  %v362_v15 = vld [vmem:[#allocation5] sm:$0xf] }
 0x236   : > { %v320_v16 = vpop.permute.xlu0 %319 }
 0x237   : > { %v2048_v17 = vmul.f32 %v320_v16, %v229_v0  ;;  %v2050_v18 = vmul.f32 %v320_v16, %v230_v1  ;;  %v406_v16 = vld [vmem:[#allocation5 + $0x8] sm:$0xf] }
 0x239   : > { %v324_v19 = vrot.slane %v2048_v17, 4  ;;  %v330_v20 = vrot.slane %v2050_v18, 4 }
 0x23b   : > { %v325_v21 = vadd.f32 %v324_v19, %v2048_v17  ;;  %v331_v22 = vadd.f32 %v330_v20, %v2050_v18  ;;  %v339_v23 = vmax.f32 %v2048_v17, %v324_v19  ;;  %v345_v24 = vmax.f32 %v2050_v18, %v330_v20 }
 0x23d   : > { %v326_v25 = vrot.slane %v325_v21, 2  ;;  %v332_v26 = vrot.slane %v331_v22, 2  ;;  %v340_v27 = vrot.slane %v339_v23, 2  ;;  %v346_v28 = vrot.slane %v345_v24, 2 }
 0x23f   : > { %v327_v29 = vadd.f32 %v326_v25, %v325_v21  ;;  %v333_v30 = vadd.f32 %v332_v26, %v331_v22  ;;  %v341_v31 = vmax.f32 %v339_v23, %v340_v27  ;;  %v347_v35 = vmax.f32 %v345_v24, %v346_v28  ;;  %v428_v27 = vld [vmem:[#allocation5 + $0xc] sm:$0xf] }
 0x241   : > { %v328_v32 = vrot.slane %v327_v29, 1  ;;  %v334_v33 = vrot.slane %v333_v30, 1  ;;  %v342_v34 = vrot.slane %v341_v31, 1  ;;  %v348_v40 = vrot.slane %v347_v35, 1 }
 0x243   : > { %v329_v36 = vadd.f32 %v328_v32, %v327_v29  ;;  %v335_v37 = vadd.f32 %v334_v33, %v333_v30  ;;  %v343_v39 = vmax.f32 %v341_v31, %v342_v34  ;;  %v349_v43 = vmax.f32 %v347_v35, %v348_v40  ;;  %v450_v40 = vld [vmem:[#allocation5 + $0x10] sm:$0xf] }
 0x245   : > { %v336_v38 = vmul.f32 0.125, %v329_v36  ;;  %v337_v41 = vmul.f32 0.125, %v335_v37 }
 0x247   : > { %v2058_v42 = vsel %vm350_vm2, %v336_v38, %v343_v39  ;;  %v2063_v44 = vsel %vm350_vm2, %v337_v41, %v349_v43  ;;  %vm688_vm2 = vcmp.lt.s32.totalorder %v2184_v52, 18 }
 0x248   : > { %486 = vrot.lane.b32.xlu0 %v2058_v42, %s1846_s28  ;;  %353 = vrot.lane.b32.xlu1 %v2058_v42, %s1847_s29 }
 0x24c   : > { %508 = vrot.lane.b32.xlu0 %v2058_v42, %s1848_s7  ;;  %355 = vrot.lane.b32.xlu1 %v2063_v44, %s1847_s29  ;;  %s1861_s29 = smov 17  }
 0x250   : > { %530 = vrot.lane.b32.xlu0 %v2058_v42, %s1849_s8  ;;  %376 = vrot.lane.b32.xlu1 %v2058_v42, %s1850_s12 }
 0x254   : > { %552 = vrot.lane.b32.xlu0 %v2058_v42, %s1851_s13  ;;  %378 = vrot.lane.b32.xlu1 %v2063_v44, %s1850_s12  ;;  %s1862_s12 = smov 46  }
 0x258   : > { %574 = vrot.lane.b32.xlu0 %v2058_v42, %s1852_s11  ;;  %398 = vrot.lane.b32.xlu1 %v2058_v42, %s1853_s14 }
 0x25c   : > { %596 = vrot.lane.b32.xlu0 %v2058_v42, %s1854_s20  ;;  %400 = vrot.lane.b32.xlu1 %v2063_v44, %s1853_s14  ;;  %s1863_s14 = smov 16  }
 0x260   : > { %618 = vrot.lane.b32.xlu0 %v2058_v42, %s1855_s5  ;;  %420 = vrot.lane.b32.xlu1 %v2058_v42, %s1856_s6 }
 0x264   : > { %640 = vrot.lane.b32.xlu0 %v2058_v42, %s1857_s23  ;;  %422 = vrot.lane.b32.xlu1 %v2063_v44, %s1856_s6  ;;  %s1864_s6 = smov 15  }
 0x268   : > { %662 = vrot.lane.b32.xlu0 %v2058_v42, %s1858_s24  ;;  %442 = vrot.lane.b32.xlu1 %v2058_v42, %s1859_s21 }
 0x26c   : > { %684 = vrot.lane.b32.xlu0 %v2058_v42, %s1860_s26  ;;  %444 = vrot.lane.b32.xlu1 %v2063_v44, %s1859_s21  ;;  %s1865_s21 = smov 14  }
 0x270   : > { %706 = vrot.lane.b32.xlu0 %v2058_v42, %s1861_s29  ;;  %464 = vrot.lane.b32.xlu1 %v2058_v42, %s1862_s12 }
 0x274   : > { %728 = vrot.lane.b32.xlu0 %v2058_v42, %s1863_s14  ;;  %466 = vrot.lane.b32.xlu1 %v2063_v44, %s1862_s12  ;;  %s1867_s12 = smov 3  }
 0x278   : > { %750 = vrot.lane.b32.xlu0 %v2058_v42, %s1864_s6  ;;  %488 = vrot.lane.b32.xlu1 %v2063_v44, %s1846_s28  ;;  %s1868_s28 = smov 2  }
 0x27c   : > { %772 = vrot.lane.b32.xlu0 %v2058_v42, %s1865_s21  ;;  %510 = vrot.lane.b32.xlu1 %v2063_v44, %s1848_s7  ;;  %s1869_s7 = smov 1  }
 0x280   : > { %794 = vrot.lane.b32.xlu0 %v2058_v42, %s1866_s30  ;;  %532 = vrot.lane.b32.xlu1 %v2063_v44, %s1849_s8  ;;  %s1870_s8 = smov 127  }
 0x284   : > { %816 = vrot.lane.b32.xlu0 %v2058_v42, %s1867_s12  ;;  %554 = vrot.lane.b32.xlu1 %v2063_v44, %s1851_s13  ;;  %s1871_s13 = smov 126  }
 0x288   : > { %838 = vrot.lane.b32.xlu0 %v2058_v42, %s1868_s28  ;;  %576 = vrot.lane.b32.xlu1 %v2063_v44, %s1852_s11  ;;  %s1872_s11 = smov 125  }
 0x28c   : > { %860 = vrot.lane.b32.xlu0 %v2058_v42, %s1869_s7  ;;  %598 = vrot.lane.b32.xlu1 %v2063_v44, %s1854_s20  ;;  %s1873_s20 = smov 115  }
 0x290   : > { %897 = vrot.lane.b32.xlu0 %v2058_v42, %s1870_s8  ;;  %620 = vrot.lane.b32.xlu1 %v2063_v44, %s1855_s5  ;;  %s1874_s5 = smov 114  }
 0x294   : > { %919 = vrot.lane.b32.xlu0 %v2058_v42, %s1871_s13  ;;  %642 = vrot.lane.b32.xlu1 %v2063_v44, %s1857_s23  ;;  %s1875_s23 = smov 113  }
 0x298   : > { %941 = vrot.lane.b32.xlu0 %v2058_v42, %s1872_s11  ;;  %664 = vrot.lane.b32.xlu1 %v2063_v44, %s1858_s24  ;;  %s1876_s24 = smov 112  }
 0x29c   : > { %963 = vrot.lane.b32.xlu0 %v2058_v42, %s1873_s20  ;;  %686 = vrot.lane.b32.xlu1 %v2063_v44, %s1860_s26  ;;  %s1877_s26 = smov 111  }
 0x2a0   : > { %985 = vrot.lane.b32.xlu0 %v2058_v42, %s1874_s5  ;;  %708 = vrot.lane.b32.xlu1 %v2063_v44, %s1861_s29  ;;  %s1878_s29 = smov 110  }
 0x2a4   : > { %1007 = vrot.lane.b32.xlu0 %v2058_v42, %s1875_s23  ;;  %730 = vrot.lane.b32.xlu1 %v2063_v44, %s1863_s14  ;;  %s1879_s14 = smov 109  }
 0x2a8   : > { %1029 = vrot.lane.b32.xlu0 %v2058_v42, %s1876_s24  ;;  %752 = vrot.lane.b32.xlu1 %v2063_v44, %s1864_s6  ;;  %s1880_s6 = smov 99  }
 0x2ac   : > { %1051 = vrot.lane.b32.xlu0 %v2058_v42, %s1877_s26  ;;  %774 = vrot.lane.b32.xlu1 %v2063_v44, %s1865_s21  ;;  %s1881_s21 = smov 98  }
 0x2b0   : > { %1073 = vrot.lane.b32.xlu0 %v2058_v42, %s1878_s29  ;;  %796 = vrot.lane.b32.xlu1 %v2063_v44, %s1866_s30  ;;  %s1882_s30 = smov 97  }
 0x2b4   : > { %1095 = vrot.lane.b32.xlu0 %v2058_v42, %s1879_s14  ;;  %818 = vrot.lane.b32.xlu1 %v2063_v44, %s1867_s12  ;;  %s1883_s12 = smov 96  }
 0x2b8   : > { %1117 = vrot.lane.b32.xlu0 %v2058_v42, %s1880_s6  ;;  %840 = vrot.lane.b32.xlu1 %v2063_v44, %s1868_s28  ;;  %s1885_s28 = smov 95  }
 0x2ba   : > { %v2166_v45 = vpop.permute.xlu0 %486  ;;  %v354_v46 = vpop.permute.xlu1 %353 }
 0x2bc   : > { %1139 = vrot.lane.b32.xlu0 %v2058_v42, %s1881_s21  ;;  %862 = vrot.lane.b32.xlu1 %v2063_v44, %s1869_s7  ;;  %s1886_s7 = smov 94  }
 0x2be   : > { %v2172_v47 = vpop.permute.xlu0 %508  ;;  %v356_v48 = vpop.permute.xlu1 %355 }
 0x2bf   : > { %v360_v63 = vsel %vm359_vm4, %v354_v46, %v356_v48  ;;  %v361_v0 = vsel %vm359_vm4, %v356_v48, %v354_v46  ;;  %vm732_vm4 = vcmp.lt.s32.totalorder %v2184_v52, 16 }
 0x2c0   : > { %1161 = vrot.lane.b32.xlu0 %v2058_v42, %s1882_s30  ;;  %899 = vrot.lane.b32.xlu1 %v2063_v44, %s1870_s8  ;;  %v365_v7 = vcombine.low %v361_v0, %v360_v63  ;;  %s1887_s8 = smov 93  }
 0x2c2   : > { %v2178_v49 = vpop.permute.xlu0 %530  ;;  %v377_v50 = vpop.permute.xlu1 %376  ;;  %v372_v13 = vrot.slane %v365_v7, %v2203_v6 }
 0x2c4   : > { %1183 = vrot.lane.b32.xlu0 %v2058_v42, %s1883_s12  ;;  %921 = vrot.lane.b32.xlu1 %v2063_v44, %s1871_s13  ;;  %s1888_s13 = smov 83   ;;  %v374_v24 = vmul.f32 %v372_v13, %v362_v15 }
 0x2c6   : > { %v2186_v53 = vpop.permute.xlu0 %552  ;;  %v379_v54 = vpop.permute.xlu1 %378 }
 0x2c7   : > { %v381_v59 = vsel %vm380_vm3, %v377_v50, %v379_v54  ;;  %v382_v60 = vsel %vm380_vm3, %v379_v54, %v377_v50  ;;  %vm710_vm3 = vcmp.lt.s32.totalorder %v2184_v52, 17 }
 0x2c8   : > { %1205 = vrot.lane.b32.xlu0 %v2058_v42, %s1885_s28  ;;  %943 = vrot.lane.b32.xlu1 %v2063_v44, %s1872_s11  ;;  %v387_v1 = vcombine.low %v382_v60, %v381_v59  ;;  %s1889_s11 = smov 82   ;;  %v472_v59 = vld [vmem:[#allocation5 + $0x14] sm:$0xf] }
 0x2ca   : > { %v2194_v57 = vpop.permute.xlu0 %574  ;;  %v399_v58 = vpop.permute.xlu1 %398  ;;  %v394_v9 = vrot.slane %v387_v1, %v2203_v6 }
 0x2cc   : > { %1227 = vrot.lane.b32.xlu0 %v2058_v42, %s1886_s7  ;;  %965 = vrot.lane.b32.xlu1 %v2063_v44, %s1873_s20  ;;  %v396_v19 = vmul.f32 %v394_v9, %v384_v12  ;;  %s1890_s20 = smov 81  }
 0x2ce   : > { %v2201_v2 = vpop.permute.xlu0 %596  ;;  %v401_v3 = vpop.permute.xlu1 %400  ;;  %v397_v28 = vadd.f32 %v396_v19, %v374_v24 }
 0x2cf   : > { %v403_v4 = vsel %vm402_vm5, %v399_v58, %v401_v3  ;;  %v404_v5 = vsel %vm402_vm5, %v401_v3, %v399_v58  ;;  %vm754_vm5 = vcmp.lt.s32.totalorder %v2184_v52, 15 }
 0x2d0   : > { %v409_v8 = vcombine.low %v404_v5, %v403_v4  ;;  %1249 = vrot.lane.b32.xlu0 %v2058_v42, %s1887_s8  ;;  %987 = vrot.lane.b32.xlu1 %v2063_v44, %s1874_s5  ;;  %s1891_s5 = smov 80   ;;  %v494_v4 = vld [vmem:[#allocation5 + $0x18] sm:$0xf] }
 0x2d2   : > { %v2210_v10 = vpop.permute.xlu0 %618  ;;  %v421_v11 = vpop.permute.xlu1 %420  ;;  %v416_v14 = vrot.slane %v409_v8, %v2203_v6 }
 0x2d4   : > { %1271 = vrot.lane.b32.xlu0 %v2058_v42, %s1888_s13  ;;  %1009 = vrot.lane.b32.xlu1 %v2063_v44, %s1875_s23  ;;  %v418_v25 = vmul.f32 %v416_v14, %v406_v16  ;;  %s1892_s23 = smov 79   ;;  %v516_v14 = vld [vmem:[#allocation5 + $0x1c] sm:$0xf] }
 0x2d6   : > { %v2219_v20 = vpop.permute.xlu0 %640  ;;  %v423_v21 = vpop.permute.xlu1 %422  ;;  %v419_v32 = vadd.f32 %v418_v25, %v397_v28  ;;  %v538_v25 = vld [vmem:[#allocation5 + $0x20] sm:$0xf] }
 0x2d7   : > { %v425_v22 = vsel %vm424_vm6, %v421_v11, %v423_v21  ;;  %v426_v23 = vsel %vm424_vm6, %v423_v21, %v421_v11  ;;  %vm776_vm6 = vcmp.lt.s32.totalorder %v2184_v52, 14 }
 0x2d8   : > { %v431_v26 = vcombine.low %v426_v23, %v425_v22  ;;  %1293 = vrot.lane.b32.xlu0 %v2058_v42, %s1889_s11  ;;  %1031 = vrot.lane.b32.xlu1 %v2063_v44, %s1876_s24  ;;  %s1893_s24 = smov 78  }
 0x2da   : > { %v438_v29 = vrot.slane %v431_v26, %v2203_v6  ;;  %v2226_v30 = vpop.permute.xlu0 %662  ;;  %v443_v31 = vpop.permute.xlu1 %442 }
 0x2dc   : > { %v440_v33 = vmul.f32 %v438_v29, %v428_v27  ;;  %1315 = vrot.lane.b32.xlu0 %v2058_v42, %s1890_s20  ;;  %1053 = vrot.lane.b32.xlu1 %v2063_v44, %s1877_s26  ;;  %s1894_s26 = smov 77  }
 0x2de   : > { %v441_v34 = vadd.f32 %v440_v33, %v419_v32  ;;  %v2233_v35 = vpop.permute.xlu0 %684  ;;  %v445_v36 = vpop.permute.xlu1 %444 }
 0x2df   : > { %v447_v37 = vsel %vm446_vm7, %v443_v31, %v445_v36  ;;  %v448_v38 = vsel %vm446_vm7, %v445_v36, %v443_v31  ;;  %vm798_vm7 = vcmp.lt.s32.totalorder %v2184_v52, 13 }
 0x2e0   : > { %v453_v39 = vcombine.low %v448_v38, %v447_v37  ;;  %1337 = vrot.lane.b32.xlu0 %v2058_v42, %s1891_s5  ;;  %1075 = vrot.lane.b32.xlu1 %v2063_v44, %s1878_s29  ;;  %s1583_s29 = sshll.u32 %s1942_s19, 8  ;;  %s1895_s19 = smov [#allocation7]  }
 0x2e2   : > { %v460_v41 = vrot.slane %v453_v39, %v2203_v6  ;;  %v2240_v43 = vpop.permute.xlu0 %706  ;;  %v465_v46 = vpop.permute.xlu1 %464 }
 0x2e4   : > { %v462_v48 = vmul.f32 %v460_v41, %v450_v40  ;;  %1359 = vrot.lane.b32.xlu0 %v2058_v42, %s1892_s23  ;;  %1097 = vrot.lane.b32.xlu1 %v2063_v44, %s1879_s14  ;;  %s2653_s14 = sshll.u32 %s2028_s25, 4 }
 0x2e6   : > { %v463_v50 = vadd.f32 %v462_v48, %v441_v34  ;;  %v2247_v51 = vpop.permute.xlu0 %728  ;;  %v467_v54 = vpop.permute.xlu1 %466  ;;  %v560_v34 = vld [vmem:[#allocation5 + $0x24] sm:$0xf]  ;;  %v582_v48 = vld [vmem:[#allocation5 + $0x28] sm:$0xf] }
 0x2e7   : > { %v469_v55 = vsel %vm468_vm8, %v465_v46, %v467_v54  ;;  %v470_v56 = vsel %vm468_vm8, %v467_v54, %v465_v46  ;;  %vm820_vm8 = vcmp.lt.s32.totalorder %v2184_v52, 3 }
 0x2e8   : > { %v475_v58 = vcombine.low %v470_v56, %v469_v55  ;;  %1381 = vrot.lane.b32.xlu0 %v2058_v42, %s1893_s24  ;;  %1119 = vrot.lane.b32.xlu1 %v2063_v44, %s1880_s6  ;;  %s228_s6 = scalar_lea.vmem [#allocation7], %s2653_s14 }
 0x2ea   : > { %v482_v60 = vrot.slane %v475_v58, %v2203_v6  ;;  %v2255_v61 = vpop.permute.xlu0 %750  ;;  %v489_v62 = vpop.permute.xlu1 %488 }
 0x2eb   : > { %v491_v63 = vsel %vm490_vm9, %v2166_v45, %v489_v62  ;;  %v492_v0 = vsel %vm490_vm9, %v489_v62, %v2166_v45  ;;  %v604_v62 = vld [vmem:[#allocation5 + $0x2c] sm:$0xf]  ;;  %vm842_vm9 = vcmp.lt.s32.totalorder %v2184_v52, 2 }
 0x2ec   : > { %v484_v1 = vmul.f32 %v482_v60, %v472_v59  ;;  %v497_v3 = vcombine.low %v492_v0, %v491_v63  ;;  %1403 = vrot.lane.b32.xlu0 %v2058_v42, %s1894_s26  ;;  %1141 = vrot.lane.b32.xlu1 %v2063_v44, %s1881_s21  ;;  %s1482_s21 = sshll.u32 %s228_s6, 4  ;;  %s1483_s21 = int_to_ptr.vmem [resolvable:$true] %s1482_s21 }
 0x2ee   : > { %v485_v5 = vadd.f32 %v484_v1, %v463_v50  ;;  %v504_v7 = vrot.slane %v497_v3, %v2203_v6  ;;  %v2265_v8 = vpop.permute.xlu0 %772  ;;  %v511_v9 = vpop.permute.xlu1 %510 }
 0x2ef   : > { %v513_v45 = vsel %vm512_vm10, %v2172_v47, %v511_v9  ;;  %v514_v11 = vsel %vm512_vm10, %v511_v9, %v2172_v47  ;;  %v626_v9 = vld [vmem:[#allocation5 + $0x30] sm:$0xf]  ;;  %vm864_vm10 = vcmp.lt.s32.totalorder %v2184_v52, 1 }
 0x2f0   : > { %v506_v12 = vmul.f32 %v504_v7, %v494_v4  ;;  %v519_v13 = vcombine.low %v514_v11, %v513_v45  ;;  %1163 = vrot.lane.b32.xlu1 %v2063_v44, %s1882_s30 }
 0x2f2   : > { %v507_v15 = vadd.f32 %v506_v12, %v485_v5  ;;  %v526_v16 = vrot.slane %v519_v13, %v2203_v6  ;;  %v2273_v19 = vpop.permute.xlu0 %794  ;;  %v533_v21 = vpop.permute.xlu1 %532 }
 0x2f3   : > { %v535_v22 = vsel %vm534_vm11, %v2178_v49, %v533_v21  ;;  %v536_v23 = vsel %vm534_vm11, %v533_v21, %v2178_v49  ;;  %vm901_vm11 = vcmp.lt.s32.totalorder %v2184_v52, 127 }
 0x2f4   : > { %v528_v24 = vmul.f32 %v526_v16, %v516_v14  ;;  %v541_v47 = vcombine.low %v536_v23, %v535_v22  ;;  %1185 = vrot.lane.b32.xlu1 %v2063_v44, %s1883_s12  ;;  %v648_v16 = vld [vmem:[#allocation5 + $0x34] sm:$0xf] }
 0x2f6   : > { %v529_v26 = vadd.f32 %v528_v24, %v507_v15  ;;  %v548_v27 = vrot.slane %v541_v47, %v2203_v6  ;;  %v2281_v28 = vpop.permute.xlu0 %816  ;;  %v555_v29 = vpop.permute.xlu1 %554 }
 0x2f7   : > { %v557_v31 = vsel %vm556_vm12, %v2186_v53, %v555_v29  ;;  %v558_v32 = vsel %vm556_vm12, %v555_v29, %v2186_v53  ;;  %vm923_vm12 = vcmp.lt.s32.totalorder %v2184_v52, 126 }
 0x2f8   : > { %v550_v33 = vmul.f32 %v548_v27, %v538_v25  ;;  %v563_v49 = vcombine.low %v558_v32, %v557_v31  ;;  %1207 = vrot.lane.b32.xlu1 %v2063_v44, %s1885_s28  ;;  %v670_v27 = vld [vmem:[#allocation5 + $0x38] sm:$0xf]  ;;  %s1480_s28 = scalar_lea.hbm %s2636_s4, %s1583_s29 }
 0x2fa   : > { %v551_v36 = vadd.f32 %v550_v33, %v529_v26  ;;  %v570_v37 = vrot.slane %v563_v49, %v2203_v6  ;;  %v2289_v38 = vpop.permute.xlu0 %838  ;;  %v577_v39 = vpop.permute.xlu1 %576 }
 0x2fb   : > { %v579_v40 = vsel %vm578_vm13, %v2194_v57, %v577_v39  ;;  %v580_v41 = vsel %vm578_vm13, %v577_v39, %v2194_v57  ;;  %vm945_vm13 = vcmp.lt.s32.totalorder %v2184_v52, 125 }
 0x2fc   : > { %v572_v46 = vmul.f32 %v570_v37, %v560_v34  ;;  %v585_v53 = vcombine.low %v580_v41, %v579_v40  ;;  %1229 = vrot.lane.b32.xlu1 %v2063_v44, %s1886_s7  ;;  %s1468_s7 = scalar_lea.sflag [#allocation4], %s2028_s25 }
 0x2fe   : > { %v573_v50 = vadd.f32 %v572_v46, %v551_v36  ;;  %v592_v54 = vrot.slane %v585_v53, %v2203_v6  ;;  %v2297_v55 = vpop.permute.xlu0 %860  ;;  %v599_v56 = vpop.permute.xlu1 %598 }
 0x2ff   : > { %v601_v58 = vsel %vm600_vm14, %v2201_v2, %v599_v56  ;;  %v602_v59 = vsel %vm600_vm14, %v599_v56, %v2201_v2  ;;  %vm967_vm14 = vcmp.lt.s32.totalorder %v2184_v52, 115 }
 0x300   : > { %v594_v60 = vmul.f32 %v592_v54, %v582_v48  ;;  %v607_v57 = vcombine.low %v602_v59, %v601_v58  ;;  %1251 = vrot.lane.b32.xlu1 %v2063_v44, %s1887_s8  ;;  %s1769_s8 = scalar_lea.vmem %s1483_s21, 256 }
 0x301   : > { %p1770_p8 = scmp.ne.s32.totalorder %s1483_s21, %s1769_s8 }
 0x302   : > { %v595_v63 = vadd.f32 %v594_v60, %v573_v50  ;;  %v614_v0 = vrot.slane %v607_v57, %v2203_v6  ;;  %v621_v1 = vpop.permute.xlu1 %620  ;;  %v2307_v7 = vpop.permute.xlu0 %897 }
 0x303   : > { %v623_v3 = vsel %vm622_vm15, %v2210_v10, %v621_v1  ;;  %v624_v4 = vsel %vm622_vm15, %v621_v1, %v2210_v10  ;;  %vm989_vm15 = vcmp.lt.s32.totalorder %v2184_v52, 114  ;;  %p1771_p11 = pnand %p1770_p8, %p2654_p3 }
 0x304   : > { %v616_v5 = vmul.f32 %v614_v0, %v604_v62  ;;  %v629_v2 = vcombine.low %v624_v4, %v623_v3  ;;  %1273 = vrot.lane.b32.xlu1 %v2063_v44, %s1888_s13  ;;  %s1773_s13 = sshll.u32 %s1895_s19, 4  ;;  %s1774_s13 = int_to_ptr.vmem [resolvable:$false] %s1773_s13 }
 0x305   : > { %p1772_p7 = pneg %p1771_p11  ;;  %p1776_p10 = scmp.lt.s32.totalorder %s1483_s21, %s1774_s13 }
 0x306   : > { %v617_v45 = vadd.f32 %v616_v5, %v595_v63  ;;  %v636_v11 = vrot.slane %v629_v2, %v2203_v6  ;;  %v643_v12 = vpop.permute.xlu1 %642  ;;  %v2318_v22 = vpop.permute.xlu0 %919 }
 0x307   : > { %v645_v13 = vsel %vm644_vm0, %v2219_v20, %v643_v12  ;;  %v646_v14 = vsel %vm644_vm0, %v643_v12, %v2219_v20  ;;  %vm1011_vm0 = vcmp.lt.s32.totalorder %v2184_v52, 113 }
 0x308   : > { %v638_v15 = vmul.f32 %v636_v11, %v626_v9  ;;  %v651_v10 = vcombine.low %v646_v14, %v645_v13  ;;  %1295 = vrot.lane.b32.xlu1 %v2063_v44, %s1889_s11  ;;  %s1775_s11 = scalar_lea.vmem %s1774_s13, 512 }
 0x309   : > { %p1777_p2 = scmp.lt.s32.totalorder %s1775_s11, %s1769_s8 }
 0x30a   : > { %v639_v21 = vadd.f32 %v638_v15, %v617_v45  ;;  %v658_v23 = vrot.slane %v651_v10, %v2203_v6  ;;  %v665_v24 = vpop.permute.xlu1 %664  ;;  %v2326_v33 = vpop.permute.xlu0 %941 }
 0x30b   : > { %v667_v47 = vsel %vm666_vm1, %v2226_v30, %v665_v24  ;;  %v668_v25 = vsel %vm666_vm1, %v665_v24, %v2226_v30  ;;  %vm1033_vm1 = vcmp.lt.s32.totalorder %v2184_v52, 112  ;;  %p1778_p13 = por %p1777_p2, %p1776_p10 }
 0x30c   : > { %v660_v26 = vmul.f32 %v658_v23, %v648_v16  ;;  %v673_v20 = vcombine.low %v668_v25, %v667_v47  ;;  %1317 = vrot.lane.b32.xlu1 %v2063_v44, %s1890_s20 }
 0x30d   : > { %p1779_p0 = pnand %p1778_p13, %p1772_p7 }
 0x30e   : > { %v661_v29 = vadd.f32 %v660_v26, %v639_v21  ;;  %v680_v31 = vrot.slane %v673_v20, %v2203_v6  ;;  %v687_v32 = vpop.permute.xlu1 %686  ;;  %v2334_v30 = vpop.permute.xlu0 %963  ;;  %v692_v21 = vld [vmem:[#allocation5 + $0x3c] sm:$0xf]  ;;  %v714_v26 = vld [vmem:[#allocation5 + $0x40] sm:$0xf] }
 0x30f   : > { %v689_v3 = vsel %vm688_vm2, %v2233_v35, %v687_v32  ;;  %v690_v4 = vsel %vm688_vm2, %v687_v32, %v2233_v35  ;;  %vm1055_vm2 = vcmp.lt.s32.totalorder %v2184_v52, 111 }
 0x310   : > { %v682_v49 = vmul.f32 %v680_v31, %v670_v27  ;;  %1339 = vrot.lane.b32.xlu1 %v2063_v44, %s1891_s5  ;;  %v695_v45 = vcombine.low %v690_v4, %v689_v3 }
 0x312   : > { %v2330_v34 = vadd.f32 %v682_v49, %v661_v29  ;;  %v709_v36 = vpop.permute.xlu1 %708  ;;  %v2338_v40 = vpop.permute.xlu0 %985 }
 0x313   : > { %v711_v2 = vsel %vm710_vm3, %v2240_v43, %v709_v36  ;;  %v712_v9 = vsel %vm710_vm3, %v709_v36, %v2240_v43  ;;  %v702_v43 = vrot.slane %v695_v45, %v2203_v6  ;;  %vm1077_vm3 = vcmp.lt.s32.totalorder %v2184_v52, 110 }
 0x314   : > { %1361 = vrot.lane.b32.xlu1 %v2063_v44, %s1892_s23  ;;  %v717_v13 = vcombine.low %v712_v9, %v711_v2 }
 0x315   : > { %v704_v27 = vmul.f32 %v702_v43, %v692_v21 }
 0x316   : > { %v731_v37 = vpop.permute.xlu1 %730  ;;  %v2342_v46 = vpop.permute.xlu0 %1007  ;;  %v724_v24 = vrot.slane %v717_v13, %v2203_v6 }
 0x317   : > { %v733_v11 = vsel %vm732_vm4, %v2247_v51, %v731_v37  ;;  %v734_v12 = vsel %vm732_vm4, %v731_v37, %v2247_v51  ;;  %v705_v2 = vadd.f32 %v704_v27, %v2330_v34  ;;  %vm1099_vm4 = vcmp.lt.s32.totalorder %v2184_v52, 109 }
 0x318   : > { %1383 = vrot.lane.b32.xlu1 %v2063_v44, %s1893_s24  ;;  %v739_v16 = vcombine.low %v734_v12, %v733_v11  ;;  %v726_v37 = vmul.f32 %v724_v24, %v714_v26  ;;  %v824_v24 = vld [vmem:[#allocation5 + $0x54] sm:$0xf] }
 0x31a   : > { %v753_v39 = vpop.permute.xlu1 %752  ;;  %v2344_v50 = vpop.permute.xlu0 %1029  ;;  %v746_v29 = vrot.slane %v739_v16, %v2203_v6  ;;  %v727_v13 = vadd.f32 %v726_v37, %v705_v2 }
 0x31b   : > { %v755_v15 = vsel %vm754_vm5, %v2255_v61, %v753_v39  ;;  %v756_v10 = vsel %vm754_vm5, %v753_v39, %v2255_v61  ;;  %vm1121_vm5 = vcmp.lt.s32.totalorder %v2184_v52, 99 }
 0x31c   : > { %1405 = vrot.lane.b32.xlu1 %v2063_v44, %s1894_s26  ;;  %v761_v47 = vcombine.low %v756_v10, %v755_v15 }
 0x31e   : > { %v775_v41 = vpop.permute.xlu1 %774  ;;  %v2346_v56 = vpop.permute.xlu0 %1051  ;;  %v768_v39 = vrot.slane %v761_v47, %v2203_v6 }
 0x31f   : > { %v777_v23 = vsel %vm776_vm6, %v2265_v8, %v775_v41  ;;  %v778_v51 = vsel %vm776_vm6, %v775_v41, %v2265_v8  ;;  %v736_v8 = vld [vmem:[#allocation5 + $0x44] sm:$0xf]  ;;  %vm1143_vm6 = vcmp.lt.s32.totalorder %v2184_v52, 98 }
 0x320   : > { %v783_v31 = vcombine.low %v778_v51, %v777_v23  ;;  %v748_v9 = vmul.f32 %v746_v29, %v736_v8  ;;  %v868_v8 = vld [vmem:[#allocation5 + $0x5c] sm:$0xf] }
 0x322   : > { %v797_v53 = vpop.permute.xlu1 %796  ;;  %v2350_v60 = vpop.permute.xlu0 %1073  ;;  %v790_v45 = vrot.slane %v783_v31, %v2203_v6  ;;  %v749_v34 = vadd.f32 %v748_v9, %v727_v13 }
 0x323   : > { %v799_v61 = vsel %vm798_vm7, %v2273_v19, %v797_v53  ;;  %v800_v20 = vsel %vm798_vm7, %v797_v53, %v2273_v19  ;;  %v758_v53 = vld [vmem:[#allocation5 + $0x48] sm:$0xf]  ;;  %vm1165_vm7 = vcmp.lt.s32.totalorder %v2184_v52, 97 }
 0x324   : > { %v805_v41 = vcombine.low %v800_v20, %v799_v61  ;;  %v770_v15 = vmul.f32 %v768_v39, %v758_v53  ;;  %v846_v61 = vld [vmem:[#allocation5 + $0x58] sm:$0xf] }
 0x326   : > { %v819_v48 = vpop.permute.xlu1 %818  ;;  %v2354_v62 = vpop.permute.xlu0 %1095  ;;  %v812_v10 = vrot.slane %v805_v41, %v2203_v6  ;;  %v771_v47 = vadd.f32 %v770_v15, %v749_v34  ;;  %v886_v41 = vcombine.low %v2058_v42, %v2063_v44  ;;  %v905_v15 = vld [vmem:[#allocation5 + $0x64] sm:$0xf] }
 0x327   : > { %v821_v49 = vsel %vm820_vm8, %v2281_v28, %v819_v48  ;;  %v822_v36 = vsel %vm820_vm8, %v819_v48, %v2281_v28  ;;  %v780_v28 = vld [vmem:[#allocation5 + $0x4c] sm:$0xf]  ;;  %vm1187_vm8 = vcmp.lt.s32.totalorder %v2184_v52, 96 }
 0x328   : > { %v827_v11 = vcombine.low %v822_v36, %v821_v49 }
 0x32a   : > { %v841_v54 = vpop.permute.xlu1 %840  ;;  %v2362_v1 = vpop.permute.xlu0 %1117  ;;  %v834_v23 = vrot.slane %v827_v11, %v2203_v6 }
 0x32b   : > { %v843_v3 = vsel %vm842_vm9, %v2289_v38, %v841_v54  ;;  %v844_v4 = vsel %vm842_vm9, %v841_v54, %v2289_v38  ;;  %v802_v38 = vld [vmem:[#allocation5 + $0x50] sm:$0xf]  ;;  %v792_v54 = vmul.f32 %v790_v45, %v780_v28  ;;  %vm1209_vm9 = vcmp.lt.s32.totalorder %v2184_v52, 95 }
 0x32c   : > { %v849_v43 = vcombine.low %v844_v4, %v843_v3  ;;  %v814_v26 = vmul.f32 %v812_v10, %v802_v38  ;;  %v836_v27 = vmul.f32 %v834_v23, %v824_v24 }
 0x32d   : > { %v793_v20 = vadd.f32 %v792_v54, %v771_v47 }
 0x32e   : > { %v863_v58 = vpop.permute.xlu1 %862  ;;  %v2375_v14 = vpop.permute.xlu0 %1139 }
 0x32f   : > { %v865_v48 = vsel %vm864_vm10, %v2297_v55, %v863_v58  ;;  %v866_v12 = vsel %vm864_vm10, %v863_v58, %v2297_v55  ;;  %v856_v55 = vrot.slane %v849_v43, %v2203_v6  ;;  %v815_v37 = vadd.f32 %v814_v26, %v793_v20 }
 0x330   : > { %v871_v51 = vcombine.low %v866_v12, %v865_v48  ;;  %vm1231_vm10 = vcmp.lt.s32.totalorder %v2184_v52, 94 }
 0x331   : > { %v858_v39 = vmul.f32 %v856_v55, %v846_v61  ;;  %v837_v2 = vadd.f32 %v836_v27, %v815_v37  ;;  %v949_v55 = vld [vmem:[#allocation5 + $0x6c] sm:$0xf] }
 0x332   : > { %v2348_v59 = vpop.permute.xlu1 %899  ;;  %v2393_v32 = vpop.permute.xlu0 %1161  ;;  %v878_v29 = vrot.slane %v871_v51, %v2203_v6 }
 0x333   : > { %v902_v49 = vsel %vm901_vm11, %v2307_v7, %v2348_v59  ;;  %v903_v36 = vsel %vm901_vm11, %v2348_v59, %v2307_v7  ;;  %v859_v44 = vadd.f32 %v858_v39, %v837_v2  ;;  %v893_v59 = vrot.slane %v886_v41, %v2203_v6  ;;  %v993_v41 = vld [vmem:[#allocation5 + $0x74] sm:$0xf] }
 0x334   : > { %v880_v9 = vmul.f32 %v878_v29, %v868_v8  ;;  %v908_v45 = vcombine.low %v902_v49, %v903_v36  ;;  %v971_v8 = vld [vmem:[#allocation5 + $0x70] sm:$0xf]  ;;  %vm1253_vm11 = vcmp.lt.s32.totalorder %v2184_v52, 93 }
 0x336   : > { %v2352_v57 = vpop.permute.xlu1 %921  ;;  %v2408_v16 = vpop.permute.xlu0 %1183  ;;  %v881_v13 = vadd.f32 %v880_v9, %v859_v44 }
 0x337   : > { %v924_v3 = vsel %vm923_vm12, %v2318_v22, %v2352_v57  ;;  %v925_v4 = vsel %vm923_vm12, %v2352_v57, %v2318_v22  ;;  %v883_v57 = vld [vmem:[#allocation5 + $0x60] sm:$0xf]  ;;  %vm1275_vm12 = vcmp.lt.s32.totalorder %v2184_v52, 83 }
 0x338   : > { %v930_v11 = vcombine.low %v924_v3, %v925_v4  ;;  %v895_v38 = vmul.f32 %v893_v59, %v883_v57 }
 0x33a   : > { %v2356_v63 = vpop.permute.xlu1 %943  ;;  %v2419_v31 = vpop.permute.xlu0 %1205  ;;  %v937_v34 = vrot.slane %v930_v11, %v2203_v6  ;;  %v896_v24 = vadd.f32 %v895_v38, %v881_v13 }
 0x33b   : > { %v946_v7 = vsel %vm945_vm13, %v2326_v33, %v2356_v63  ;;  %v947_v42 = vsel %vm945_vm13, %v2356_v63, %v2326_v33  ;;  %v915_v33 = vrot.slane %v908_v45, %v2203_v6  ;;  %vm1297_vm13 = vcmp.lt.s32.totalorder %v2184_v52, 82 }
 0x33c   : > { %v952_v63 = vcombine.low %v946_v7, %v947_v42  ;;  %v1015_v42 = vld [vmem:[#allocation5 + $0x78] sm:$0xf] }
 0x33d   : > { %v917_v47 = vmul.f32 %v915_v33, %v905_v15 }
 0x33e   : > { %v2359_v0 = vpop.permute.xlu1 %965  ;;  %v2440_v28 = vpop.permute.xlu0 %1227 }
 0x33f   : > { %v968_v48 = vsel %vm967_vm14, %v2334_v30, %v2359_v0  ;;  %v969_v12 = vsel %vm967_vm14, %v2359_v0, %v2334_v30  ;;  %v927_v0 = vld [vmem:[#allocation5 + $0x68] sm:$0xf]  ;;  %vm1319_vm14 = vcmp.lt.s32.totalorder %v2184_v52, 81 }
 0x340   : > { %v974_v54 = vcombine.low %v968_v48, %v969_v12  ;;  %v939_v27 = vmul.f32 %v937_v34, %v927_v0  ;;  %v1037_v48 = vld [vmem:[#allocation5 + $0x7c] sm:$0xf] }
 0x342   : > { %v2367_v5 = vpop.permute.xlu1 %987  ;;  %v981_v29 = vrot.slane %v974_v54, %v2203_v6 }
 0x343   : > { %v990_v10 = vsel %vm989_vm15, %v2338_v40, %v2367_v5  ;;  %v991_v43 = vsel %vm989_vm15, %v2367_v5, %v2338_v40  ;;  %v959_v40 = vrot.slane %v952_v63, %v2203_v6  ;;  %v2465_v5 = vpop.permute.xlu0 %1249  ;;  %vm1341_vm15 = vcmp.lt.s32.totalorder %v2184_v52, 80 }
 0x344   : > { %v996_v26 = vcombine.low %v990_v10, %v991_v43  ;;  %v983_v9 = vmul.f32 %v981_v29, %v971_v8  ;;  %v1059_v10 = vld [vmem:[#allocation5 + $0x80] sm:$0xf] }
 0x346   : > { %v2377_v35 = vpop.permute.xlu1 %1009  ;;  %v1003_v37 = vrot.slane %v996_v26, %v2203_v6 }
 0x347   : > { %v1012_v23 = vsel %vm1011_vm0, %v2342_v46, %v2377_v35  ;;  %v1013_v51 = vsel %vm1011_vm0, %v2377_v35, %v2342_v46  ;;  %v2488_v45 = vpop.permute.xlu0 %1271  ;;  %vm1363_vm0 = vcmp.lt.s32.totalorder %v2184_v52, 79 }
 0x348   : > { %v1018_v46 = vcombine.low %v1012_v23, %v1013_v51  ;;  %v1005_v59 = vmul.f32 %v1003_v37, %v993_v41  ;;  %v1081_v23 = vld [vmem:[#allocation5 + $0x84] sm:$0xf] }
 0x34a   : > { %v2387_v25 = vpop.permute.xlu1 %1031 }
 0x34b   : > { %v1034_v61 = vsel %vm1033_vm1, %v2344_v50, %v2387_v25  ;;  %v1035_v20 = vsel %vm1033_vm1, %v2387_v25, %v2344_v50  ;;  %v918_v50 = vadd.f32 %v917_v47, %v896_v24  ;;  %v961_v25 = vmul.f32 %v959_v40, %v949_v55  ;;  %v1103_v55 = vld [vmem:[#allocation5 + $0x88] sm:$0xf] }
 0x34c   : > { %v1040_v39 = vcombine.low %v1034_v61, %v1035_v20  ;;  %vm1385_vm1 = vcmp.lt.s32.totalorder %v2184_v52, 78 }
 0x34d   : > { %v940_v2 = vadd.f32 %v939_v27, %v918_v50 }
 0x34e   : > { %v2399_v19 = vpop.permute.xlu1 %1053  ;;  %v1047_v11 = vrot.slane %v1040_v39, %v2203_v6  ;;  %v1147_v39 = vld [vmem:[#allocation5 + $0x90] sm:$0xf] }
 0x34f   : > { %v1056_v49 = vsel %vm1055_vm2, %v2346_v56, %v2399_v19  ;;  %v1057_v36 = vsel %vm1055_vm2, %v2399_v19, %v2346_v56  ;;  %v1025_v56 = vrot.slane %v1018_v46, %v2203_v6  ;;  %v1125_v46 = vld [vmem:[#allocation5 + $0x8c] sm:$0xf]  ;;  %vm1407_vm2 = vcmp.lt.s32.totalorder %v2184_v52, 77 }
 0x350   : > { %v1062_v19 = vcombine.low %v1056_v49, %v1057_v36  ;;  %v1049_v34 = vmul.f32 %v1047_v11, %v1037_v48 }
 0x352   : > { %v2410_v21 = vpop.permute.xlu1 %1075  ;;  %v1069_v33 = vrot.slane %v1062_v19, %v2203_v6 }
 0x353   : > { %v1078_v3 = vsel %vm1077_vm3, %v2350_v60, %v2410_v21  ;;  %v1079_v4 = vsel %vm1077_vm3, %v2410_v21, %v2350_v60  ;;  %v962_v21 = vadd.f32 %v961_v25, %v940_v2  ;;  %vm1436_vm3 = vcmask 1041408  }
 0x354   : > { %v1084_v57 = vcombine.low %v1078_v3, %v1079_v4 }
 0x356   : > { %v2415_v58 = vpop.permute.xlu1 %1097  ;;  %v1091_v54 = vrot.slane %v1084_v57, %v2203_v6 }
 0x357   : > { %v1100_v44 = vsel %vm1099_vm4, %v2354_v62, %v2415_v58  ;;  %v1101_v60 = vsel %vm1099_vm4, %v2415_v58, %v2354_v62  ;;  %v984_v62 = vadd.f32 %v983_v9, %v962_v21  ;;  %v1027_v58 = vmul.f32 %v1025_v56, %v1015_v42  ;;  %v1169_v56 = vld [vmem:[#allocation5 + $0x94] sm:$0xf] }
 0x358   : > { %v1106_v63 = vcombine.low %v1100_v44, %v1101_v60 }
 0x35a   : > { %v2428_v53 = vpop.permute.xlu1 %1119  ;;  %v1113_v47 = vrot.slane %v1106_v63, %v2203_v6 }
 0x35b   : > { %v1122_v12 = vsel %vm1121_vm5, %v2362_v1, %v2428_v53  ;;  %v1123_v13 = vsel %vm1121_vm5, %v2428_v53, %v2362_v1  ;;  %v1006_v1 = vadd.f32 %v1005_v59, %v984_v62  ;;  %v1294_v53 = vpop.permute.xlu0 %1293  ;;  %v1191_v59 = vld [vmem:[#allocation5 + $0x98] sm:$0xf] }
 0x35c   : > { %v1128_v0 = vcombine.low %v1122_v12, %v1123_v13 }
 0x35e   : > { %v2443_v22 = vpop.permute.xlu1 %1141  ;;  %v1135_v27 = vrot.slane %v1128_v0, %v2203_v6 }
 0x35f   : > { %v1144_v43 = vsel %vm1143_vm6, %v2375_v14, %v2443_v22  ;;  %v1145_v38 = vsel %vm1143_vm6, %v2443_v22, %v2375_v14  ;;  %v1028_v14 = vadd.f32 %v1027_v58, %v1006_v1  ;;  %v1071_v22 = vmul.f32 %v1069_v33, %v1059_v10  ;;  %v1316_v36 = vpop.permute.xlu0 %1315  ;;  %v1213_v58 = vld [vmem:[#allocation5 + $0x9c] sm:$0xf]  ;;  %v1235_v1 = vld [vmem:[#allocation5 + $0xa0] sm:$0xf] }
 0x360   : > { %v1150_v40 = vcombine.low %v1144_v43, %v1145_v38  ;;  %v1137_v4 = vmul.f32 %v1135_v27, %v1125_v46 }
 0x362   : > { %v2457_v30 = vpop.permute.xlu1 %1163  ;;  %v1157_v50 = vrot.slane %v1150_v40, %v2203_v6 }
 0x363   : > { %v1166_v51 = vsel %vm1165_vm7, %v2393_v32, %v2457_v30  ;;  %v1167_v24 = vsel %vm1165_vm7, %v2457_v30, %v2393_v32  ;;  %v1050_v32 = vadd.f32 %v1049_v34, %v1028_v14  ;;  %v1093_v30 = vmul.f32 %v1091_v54, %v1081_v23 }
 0x364   : > { %v1172_v29 = vcombine.low %v1166_v51, %v1167_v24  ;;  %v1257_v24 = vld [vmem:[#allocation5 + $0xa4] sm:$0xf] }
 0x366   : > { %v1186_v35 = vpop.permute.xlu1 %1185  ;;  %v1179_v2 = vrot.slane %v1172_v29, %v2203_v6 }
 0x367   : > { %v1188_v61 = vsel %vm1187_vm8, %v2408_v16, %v1186_v35  ;;  %v1189_v20 = vsel %vm1187_vm8, %v1186_v35, %v2408_v16  ;;  %v1072_v16 = vadd.f32 %v1071_v22, %v1050_v32  ;;  %v1115_v35 = vmul.f32 %v1113_v47, %v1103_v55 }
 0x368   : > { %v1194_v25 = vcombine.low %v1188_v61, %v1189_v20  ;;  %v1181_v12 = vmul.f32 %v1179_v2, %v1169_v56  ;;  %v1279_v61 = vld [vmem:[#allocation5 + $0xa8] sm:$0xf]  ;;  %v1345_v2 = vld [vmem:[#allocation5 + $0xb4] sm:$0xf] }
 0x36a   : > { %v1208_v7 = vpop.permute.xlu1 %1207  ;;  %v1201_v44 = vrot.slane %v1194_v25, %v2203_v6 }
 0x36b   : > { %v1210_v8 = vsel %vm1209_vm9, %v2419_v31, %v1208_v7  ;;  %v1211_v49 = vsel %vm1209_vm9, %v1208_v7, %v2419_v31  ;;  %v1094_v31 = vadd.f32 %v1093_v30, %v1072_v16 }
 0x36c   : > { %v1216_v9 = vcombine.low %v1210_v8, %v1211_v49  ;;  %v1203_v10 = vmul.f32 %v1201_v44, %v1191_v59  ;;  %v1301_v8 = vld [vmem:[#allocation5 + $0xac] sm:$0xf] }
 0x36d   : > { %v1116_v42 = vadd.f32 %v1115_v35, %v1094_v31 }
 0x36e   : > { %v1230_v15 = vpop.permute.xlu1 %1229  ;;  %v1223_v13 = vrot.slane %v1216_v9, %v2203_v6 }
 0x36f   : > { %v1232_v41 = vsel %vm1231_vm10, %v2440_v28, %v1230_v15  ;;  %v1233_v3 = vsel %vm1231_vm10, %v1230_v15, %v2440_v28  ;;  %v1159_v28 = vmul.f32 %v1157_v50, %v1147_v39  ;;  %v1138_v48 = vadd.f32 %v1137_v4, %v1116_v42  ;;  %v1323_v50 = vld [vmem:[#allocation5 + $0xb0] sm:$0xf]  ;;  %v1367_v42 = vld [vmem:[#allocation5 + $0xb8] sm:$0xf] }
 0x370   : > { %v1238_v60 = vcombine.low %v1232_v41, %v1233_v3  ;;  %v1225_v23 = vmul.f32 %v1223_v13, %v1213_v58 }
 0x371   : > { %v1160_v15 = vadd.f32 %v1159_v28, %v1138_v48 }
 0x372   : > { %v1252_v26 = vpop.permute.xlu1 %1251  ;;  %v1245_v43 = vrot.slane %v1238_v60, %v2203_v6 }
 0x373   : > { %v1254_v19 = vsel %vm1253_vm11, %v2465_v5, %v1252_v26  ;;  %v1255_v7 = vsel %vm1253_vm11, %v1252_v26, %v2465_v5  ;;  %v1338_v5 = vpop.permute.xlu0 %1337  ;;  %v1182_v0 = vadd.f32 %v1181_v12, %v1160_v15 }
 0x374   : > { %v1260_v62 = vcombine.low %v1254_v19, %v1255_v7  ;;  %v1247_v47 = vmul.f32 %v1245_v43, %v1235_v1 }
 0x375   : > { %v1204_v22 = vadd.f32 %v1203_v10, %v1182_v0  ;;  %v1411_v10 = vld [vmem:[#allocation5 + $0xc0] sm:$0xf] }
 0x376   : > { %v1274_v37 = vpop.permute.xlu1 %1273  ;;  %v1267_v51 = vrot.slane %v1260_v62, %v2203_v6 }
 0x377   : > { %v1276_v11 = vsel %vm1275_vm12, %v2488_v45, %v1274_v37  ;;  %v1277_v57 = vsel %vm1275_vm12, %v1274_v37, %v2488_v45  ;;  %v1360_v14 = vpop.permute.xlu0 %1359  ;;  %v1226_v30 = vadd.f32 %v1225_v23, %v1204_v22 }
 0x378   : > { %v1282_v45 = vcombine.low %v1276_v11, %v1277_v57  ;;  %v1269_v27 = vmul.f32 %v1267_v51, %v1257_v24  ;;  %v1389_v11 = vld [vmem:[#allocation5 + $0xbc] sm:$0xf] }
 0x379   : > { %v1248_v49 = vadd.f32 %v1247_v47, %v1226_v30 }
 0x37a   : > { %v1296_v21 = vpop.permute.xlu1 %1295  ;;  %v1289_v40 = vrot.slane %v1282_v45, %v2203_v6 }
 0x37b   : > { %v1298_v33 = vsel %vm1297_vm13, %v1294_v53, %v1296_v21  ;;  %v1299_v63 = vsel %vm1297_vm13, %v1296_v21, %v1294_v53  ;;  %v1382_v39 = vpop.permute.xlu0 %1381  ;;  %v1270_v41 = vadd.f32 %v1269_v27, %v1248_v49 }
 0x37c   : > { %v1304_v53 = vcombine.low %v1298_v33, %v1299_v63 }
 0x37e   : > { %v1318_v38 = vpop.permute.xlu1 %1317  ;;  %v1311_v29 = vrot.slane %v1304_v53, %v2203_v6 }
 0x37f   : > { %v1320_v34 = vsel %vm1319_vm14, %v1316_v36, %v1318_v38  ;;  %v1321_v54 = vsel %vm1319_vm14, %v1318_v38, %v1316_v36  ;;  %v1291_v36 = vmul.f32 %v1289_v40, %v1279_v61  ;;  %v1404_v57 = vpop.permute.xlu0 %1403 }
 0x380   : > { %v1326_v26 = vcombine.low %v1320_v34, %v1321_v54  ;;  %v1313_v3 = vmul.f32 %v1311_v29, %v1301_v8 }
 0x381   : > { %v1292_v9 = vadd.f32 %v1291_v36, %v1270_v41 }
 0x382   : > { %v1340_v55 = vpop.permute.xlu1 %1339  ;;  %v1333_v16 = vrot.slane %v1326_v26, %v2203_v6 }
 0x383   : > { %v1342_v20 = vsel %vm1341_vm15, %v1338_v5, %v1340_v55  ;;  %v1343_v32 = vsel %vm1341_vm15, %v1340_v55, %v1338_v5  ;;  %v1314_v60 = vadd.f32 %v1313_v3, %v1292_v9 }
 0x384   : > { %v1348_v46 = vcombine.low %v1342_v20, %v1343_v32  ;;  %v1335_v56 = vmul.f32 %v1333_v16, %v1323_v50 }
 0x386   : > { %v1362_v35 = vpop.permute.xlu1 %1361  ;;  %v1355_v31 = vrot.slane %v1348_v46, %v2203_v6  ;;  %v1336_v5 = vadd.f32 %v1335_v56, %v1314_v60 }
 0x387   : > { %v1364_v25 = vsel %vm1363_vm0, %v1360_v14, %v1362_v35  ;;  %v1365_v37 = vsel %vm1363_vm0, %v1362_v35, %v1360_v14 }
 0x388   : > { %v1370_v4 = vcombine.low %v1364_v25, %v1365_v37  ;;  %v1357_v21 = vmul.f32 %v1355_v31, %v1345_v2 }
 0x38a   : > { %v1377_v19 = vrot.slane %v1370_v4, %v2203_v6  ;;  %v1384_v7 = vpop.permute.xlu1 %1383  ;;  %v1358_v33 = vadd.f32 %v1357_v21, %v1336_v5 }
 0x38b   : > { %v1386_v28 = vsel %vm1385_vm1, %v1382_v39, %v1384_v7  ;;  %v1387_v44 = vsel %vm1385_vm1, %v1384_v7, %v1382_v39 }
 0x38c   : > { %v1392_v59 = vcombine.low %v1386_v28, %v1387_v44  ;;  %v1379_v48 = vmul.f32 %v1377_v19, %v1367_v42 }
 0x38e   : > { %v1399_v12 = vrot.slane %v1392_v59, %v2203_v6  ;;  %v1406_v13 = vpop.permute.xlu1 %1405  ;;  %v1380_v43 = vadd.f32 %v1379_v48, %v1358_v33 }
 0x38f   : > { %v1408_v62 = vsel %vm1407_vm2, %v1404_v57, %v1406_v13  ;;  %v1409_v58 = vsel %vm1407_vm2, %v1406_v13, %v1404_v57 }
 0x390   : > { %v1401_v63 = vmul.f32 %v1399_v12, %v1389_v11  ;;  %v1414_v15 = vcombine.low %v1408_v62, %v1409_v58 }
 0x392   : > { %v1421_v45 = vrot.slane %v1414_v15, %v2203_v6  ;;  %v1402_v38 = vadd.f32 %v1401_v63, %v1380_v43 }
 0x394   : > { %v1423_v1 = vmul.f32 %v1421_v45, %v1411_v10 }
 0x396   : > { %v1424_v34 = vadd.f32 %v1423_v1, %v1402_v38 }
 0x398   : > { %v1432_v52 = vrot.slane %v1424_v34, %v2203_v6 }
 0x39a   : > { %v1433_v54 = vcombine.high %v1432_v52, %v1432_v52  ;;  %v1437_v0 = vsel %vm1436_vm3, %v1432_v52, 0.0 }
 0x39b   : > { %v1438_v23 = vrot.slane %v1437_v0, 4 }
 0x39c   : > { %v1444_v51 = vsel %vm1436_vm3, %v1433_v54, 0.0 }
 0x39d   : > { %v1439_v53 = vadd.f32 %v1438_v23, %v1437_v0  ;;  %v1445_v24 = vrot.slane %v1444_v51, 4 }
 0x39f   : > { %v1440_v14 = vrot.slane %v1439_v53, 2  ;;  %v1446_v22 = vadd.f32 %v1445_v24, %v1444_v51 }
 0x3a1   : > { %v1441_v47 = vadd.f32 %v1440_v14, %v1439_v53  ;;  %v1447_v40 = vrot.slane %v1446_v22, 2 }
 0x3a3   : > { %v1442_v26 = vrot.slane %v1441_v47, 1  ;;  %v1448_v55 = vadd.f32 %v1447_v40, %v1446_v22 }
 0x3a5   : > { %v1443_v61 = vadd.f32 %v1442_v26, %v1441_v47  ;;  %v1449_v20 = vrot.slane %v1448_v55, 1 }
 0x3a7   : > { %v1450_v32 = vadd.f32 %v1449_v20, %v1448_v55  ;;  %v1575_v30 = vmul.f32 -1.442695, %v1443_v61 }
 0x3a9   : > { %1707 = vpow2.f32 %v1575_v30  ;;  %v1576_v6 = vmul.f32 -1.442695, %v1450_v32 }
 0x3ab   : > { %1709 = vpow2.f32 %v1576_v6 }
 0x3b6   : > { %v1708_v27 = vpop.eup %1707 }
 0x3b7   : > { %v1457_v29 = vadd.f32 1.0, %v1708_v27 }
 0x3b8   : > { %v1710_v46 = vpop.eup %1709 }
 0x3b9   : > { %v1458_v8 = vadd.f32 1.0, %v1710_v46  ;;  %1711 = vrcp.f32 %v1457_v29 }
 0x3bb   : > { %1713 = vrcp.f32 %v1458_v8 }
 0x3c6   : > { %v1712_v49 = vpop.eup %1711 }
 0x3c7   : > { %v1463_v36 = vmul.f32 %v1712_v49, %v2048_v17 }
 0x3c8   : > { %v1714_v16 = vpop.eup %1713 }
 0x3c9   : > { %v1464_v35 = vmul.f32 %v1714_v16, %v2050_v18  ;;  %1465 = vst [vmem:[%s228_s6] sm:$0xff] %v1463_v36 }
 0x3cb   : > { %1466 = vst [vmem:[%s228_s6 + $0x8] sm:$0xff] %v1464_v35 }
 0x3cc   : > { %1782 = shalt.err (!%p1779_p0)
}
 0x3cd   : > { %s1783_s20 = scalar_lea.hbm %s1480_s28, 256  ;;  %s1787_s23 = scalar_lea.hbm %s2636_s4, 512 }
 0x3ce   : > { %p1784_p5 = scmp.ne.s32.totalorder %s1480_s28, %s1783_s20  ;;  %p1788_p1 = scmp.lt.s32.totalorder %s1480_s28, %s2636_s4 }
 0x3cf   : > { %p1789_p4 = scmp.lt.s32.totalorder %s1787_s23, %s1783_s20 }
 0x3d0   : > { %p1785_p9 = pnand %p1784_p5, %p2654_p3 }
 0x3d1   : > { %p1790_p6 = por %p1789_p4, %p1788_p1 }
 0x3d2   : > { %p1786_p12 = pneg %p1785_p9 }
 0x3d4   : > { %p1791_p8 = pnand %p1790_p6, %p1786_p12 }
 0x3d6   : > { %1794 = shalt.err (!%p1791_p8)
}
 0x3d7   : > { %1597 = dma.vmem_to_hbm [thread:$0]  (%p2654_p3), %s1483_s21, 256, %s1480_s28, %s1468_s7  }
 0x3d8 PF: > { %s1494_s29 = sand.u32 1, %s1825_s15   ;;  %p2655_p11 = scmp.ne.s32.totalorder %s2643_s22, 0 }
 0x3d9   : > { %p2656_p7 = scmp.ge.s32.totalorder %s1837_s18, 2  ;;  %s1495_s14 = scalar_lea.sflag [#allocation4], %s1494_s29 }
 0x3db   : > { %p1608_p10 = pnand %p2656_p7, %p2655_p11 }
 0x3dd   : > { %p1609_p2 = pneg %p1608_p10 }
 0x3df   : > { %1820 = dma.done.wait (%p1609_p2), %s1495_s14, 256  }
 0x3e0   : > { %1822 = vsyncadd (%p1609_p2), %s1495_s14, 4294967040  ;;  %p18_p13 = scmp.ge.s32.totalorder %s1975_s27, 4   ;;  %s2657_s15 = smov %s1829_s16 }
 0x3e1   : > { %s2658_s16 = smov %s1833_s17  ;;  %s2659_s17 = smov %s1992_s9 }
 0x3e2   : > { %s2660_s18 = smov %s1975_s27  ;;  %20 = sbr.rel (!%p18_p13) target bundleno = 6 (0x6), region = 133 }
 0x3e7   :  { %1500 = vsyncpa [#allocation3], 1 }
 0x3e8   :  { %1502 = vsyncpa [#allocation3 + $0x1], 1 }
 0x3e9   :  { %1503 = vsyncpa [#allocation6], 1 }
 0x3ea   :  { %1504 = vsyncpa [#allocation4], 1 }
 0x3eb   :  { %1506 = vsyncpa [#allocation4 + $0x1], 1 }

</bundles_post_ra>
